<compile_context>
chip_gen: v5e
topology: v5e:2x2
jax: 0.10.0
libtpu: 0.0.40
codegen_flags: <defaults>
</compile_context>

<pallas_src>
import functools

import jax
import jax.numpy as jnp
from jax.experimental import pallas as pl
from jax.experimental.pallas import tpu as pltpu


def _cgps_head_kernel(x_ref, x1_ref, wx_ref, bx_ref, wi1_ref, bi1_ref,
                      id_out_ref, clsreg_out_ref, *, id_dim):
    """One row tile: fused (id|cls|reg) matmul + id1 matmul + L2-normalize."""
    x = x_ref[...]     # (TM, D)
    x1 = x1_ref[...]   # (TM, D1)

    # Fused x branch: [id_feature | fc_cls | fc_reg | zero-pad] -> (TM, id_dim+CR)
    y_x = (jnp.dot(x, wx_ref[...], preferred_element_type=jnp.float32)
           + bx_ref[...])
    # x1 branch: id_feature1 -> (TM, id1_dim)
    id_b = (jnp.dot(x1, wi1_ref[...], preferred_element_type=jnp.float32)
            + bi1_ref[...])

    id_a = y_x[:, :id_dim]       # 128-lane-aligned slice
    clsreg = y_x[:, id_dim:]     # padded [cls | reg | 0] slab, width mult of 128

    # F.normalize over concat(id_a, id_b) without materializing the concat.
    sq = (jnp.sum(id_a * id_a, axis=1, keepdims=True)
          + jnp.sum(id_b * id_b, axis=1, keepdims=True))
    # clamp_min(||x||, 1e-12) == rsqrt of squared norm clamped at eps^2 (EUP op)
    inv = jax.lax.rsqrt(jnp.maximum(sq, 1e-24))

    id_out_ref[:, :id_dim] = (id_a * inv).astype(id_out_ref.dtype)
    id_out_ref[:, id_dim:] = (id_b * inv).astype(id_out_ref.dtype)
    clsreg_out_ref[...] = clsreg.astype(clsreg_out_ref.dtype)


def fuse_cgps_params(params, compute_dtype=jnp.float32):
    """Build the fused x-branch weight/bias once (call at param-creation time).

    Returns a dict holding the kernel-ready arrays plus the column layout."""
    wc, bc = params["w_cls"], params["b_cls"]      # (D, n_cls), (1, n_cls)
    wr, br = params["w_reg"], params["b_reg"]      # (D, n_reg), (1, n_reg)
    wi, bi = params["w_id"], params["b_id"]        # (D, 128),   (1, 128)
    wi1, bi1 = params["w_id1"], params["b_id1"]    # (D1, 128),  (1, 128)

    D = wc.shape[0]
    n_cls, n_reg = wc.shape[1], wr.shape[1]
    id_dim, id1_dim = wi.shape[1], wi1.shape[1]
    # Lane-alignment assumptions for the in-kernel slicing / unmasked stores.
    assert id_dim % 128 == 0 and id1_dim % 128 == 0, (
        "id feature dims must be multiples of 128 lanes")

    # Pad the (cls | reg) columns out to a multiple of 128 lanes so every
    # kernel store is full-width / unmasked.
    cr_pad = 128 * pl.cdiv(n_cls + n_reg, 128)
    zpad_w = cr_pad - (n_cls + n_reg)
    w_x = jnp.concatenate(
        [wi, wc, wr, jnp.zeros((D, zpad_w), wi.dtype)], axis=1)
    b_x = jnp.concatenate(
        [bi, bc, br, jnp.zeros((1, zpad_w), jnp.float32)], axis=1)

    return {
        "w_x": w_x.astype(compute_dtype),      # (D, id_dim + cr_pad)
        "b_x": b_x.astype(jnp.float32),        # (1, id_dim + cr_pad)
        "w_id1": wi1.astype(compute_dtype),    # (D1, id1_dim)
        "b_id1": bi1.astype(jnp.float32),      # (1, id1_dim)
        "n_cls": n_cls, "n_reg": n_reg,
        "id_dim": id_dim, "id1_dim": id1_dim, "cr_pad": cr_pad,
        "compute_dtype": compute_dtype,
    }


def _choose_tm(n):
    """Row tile: single grid step when the problem is small, else 256 rows
    (fills the 256-wide MXU M dim on v6e/v7x and keeps padding small)."""
    if n <= 512:
        return 8 * pl.cdiv(max(n, 8), 8)
    return 256


def cgps_head_forward(x1, x, fused, *, tm=None):
    """Forward pass of CGPSHead: returns (cls_score, bbox_pred, id_pred).

    Args:
      x1: (N, C//2, H, W) NCHW roi features for the id_feature1 branch.
      x:  (N, C,    H, W) NCHW roi features (main branch).
      fused: output of fuse_cgps_params (fused weights built once, off the
        per-call path).
      tm: optional row-tile override (multiple of 8).
    """
    compute_dtype = fused["compute_dtype"]
    N = x.shape[0]
    xf = x.reshape(N, -1).astype(compute_dtype)    # (N, D)
    x1f = x1.reshape(N, -1).astype(compute_dtype)  # (N, D1)
    D, D1 = xf.shape[1], x1f.shape[1]

    n_cls, n_reg = fused["n_cls"], fused["n_reg"]
    id_dim, id1_dim, cr_pad = fused["id_dim"], fused["id1_dim"], fused["cr_pad"]
    id_w = id_dim + id1_dim

    if tm is None:
        tm = _choose_tm(N)

    # Minimal row padding (a few rows in the single-step case).
    n_pad = tm * pl.cdiv(N, tm)
    if n_pad != N:
        xf = jnp.pad(xf, ((0, n_pad - N), (0, 0)))
        x1f = jnp.pad(x1f, ((0, n_pad - N), (0, 0)))

    grid = (n_pad // tm,)
    row_spec = lambda d: pl.BlockSpec((tm, d), lambda i: (i, 0))
    full_spec = lambda r, c: pl.BlockSpec((r, c), lambda i: (0, 0))

    # VMEM budget: double-buffered streamed row tiles + resident weights/biases
    # + double-buffered outputs, clamped to the 64 MiB v7x physical VMEM.
    in_b = jnp.dtype(compute_dtype).itemsize
    vmem_need = (2 * tm * (D + D1) * in_b                       # streamed tiles
                 + (D * (id_dim + cr_pad) + D1 * id1_dim) * in_b  # weights
                 + (id_dim + cr_pad + id1_dim) * 4                # biases
                 + 2 * tm * (id_w + cr_pad) * 4)                  # outputs
    vmem_limit = int(min(64 * 2**20, max(32 * 2**20, int(1.5 * vmem_need))))

    kernel = functools.partial(_cgps_head_kernel, id_dim=id_dim)

    id_out, clsreg_out = pl.pallas_call(
        kernel,
        out_shape=(jax.ShapeDtypeStruct((n_pad, id_w), jnp.float32),
                   jax.ShapeDtypeStruct((n_pad, cr_pad), jnp.float32)),
        grid_spec=pltpu.PrefetchScalarGridSpec(
            num_scalar_prefetch=0,
            grid=grid,
            in_specs=[
                row_spec(D),                       # x tile (streamed)
                row_spec(D1),                      # x1 tile (streamed)
                full_spec(D, id_dim + cr_pad),     # fused x weight (resident)
                full_spec(1, id_dim + cr_pad),     # fused x bias
                full_spec(D1, id1_dim),            # id_feature1 weight (resident)
                full_spec(1, id1_dim),             # id_feature1 bias
            ],
            out_specs=[row_spec(id_w), row_spec(cr_pad)],
        ),
        compiler_params=pltpu.CompilerParams(
            dimension_semantics=("parallel",),
            vmem_limit_bytes=vmem_limit),
    )(xf, x1f, fused["w_x"], fused["b_x"], fused["w_id1"], fused["b_id1"])

    # id_pred is already lane-dense and exactly (N, 256) after the row slice;
    # only the tiny cls/reg columns are sliced from the 128-wide clsreg slab.
    id_pred = id_out[:N]
    cls_score = clsreg_out[:N, :n_cls]
    bbox_pred = clsreg_out[:N, n_cls:n_cls + n_reg]
    return cls_score, bbox_pred, id_pred


def make_params(key, in_dim, in_dim_half, num_classes):
    """Deterministic init following CGPSHead.init_weights (normal std / zero bias).
    Weights are stored transposed (in, out) for the kernel."""
    k_cls, k_reg, k_id, k_id1 = jax.random.split(key, 4)
    n_cls = num_classes + 1
    n_reg = 4 * num_classes  # reg_class_agnostic=False
    params = {
        "w_cls": 0.01 * jax.random.normal(k_cls, (in_dim, n_cls), jnp.float32),
        "b_cls": jnp.zeros((1, n_cls), jnp.float32),
        "w_reg": 0.001 * jax.random.normal(k_reg, (in_dim, n_reg), jnp.float32),
        "b_reg": jnp.zeros((1, n_reg), jnp.float32),
        "w_id": 0.001 * jax.random.normal(k_id, (in_dim, 128), jnp.float32),
        "b_id": jnp.zeros((1, 128), jnp.float32),
        "w_id1": 0.001 * jax.random.normal(k_id1, (in_dim_half, 128), jnp.float32),
        "b_id1": jnp.zeros((1, 128), jnp.float32),
    }
    return params


def reference_forward(x1, x, params):
    """Plain-JAX reference matching the PyTorch forward semantics."""
    N = x.shape[0]
    xf = x.reshape(N, -1).astype(jnp.float32)
    x1f = x1.reshape(N, -1).astype(jnp.float32)
    cls_score = xf @ params["w_cls"] + params["b_cls"]
    bbox_pred = xf @ params["w_reg"] + params["b_reg"]
    id_a = xf @ params["w_id"] + params["b_id"]
    id_b = x1f @ params["w_id1"] + params["b_id1"]
    id_cat = jnp.concatenate([id_a, id_b], axis=1)
    norm = jnp.maximum(jnp.linalg.norm(id_cat, axis=1, keepdims=True), 1e-12)
    return cls_score, bbox_pred, id_cat / norm


if __name__ == "__main__":
    # RoI-head-like but small shapes: N RoIs, main branch (N, C, H, W), aux
    # branch has C // 2 channels (id_feature1 takes in_channels // 2).
    # D = C*H*W = 256, D1 = 128. N=300 exercises row padding (to 304) with a
    # single grid step.
    N, C, H, W = 300, 16, 4, 4
    num_classes = 1  # person search: person vs background

    key = jax.random.PRNGKey(0)
    kx, kx1, kp = jax.random.split(key, 3)
    x = jax.random.normal(kx, (N, C, H, W), jnp.float32)         # NCHW
    x1 = jax.random.normal(kx1, (N, C // 2, H, W), jnp.float32)  # NCHW

    params = make_params(kp, C * H * W, (C // 2) * H * W, num_classes)
    # Fused weights are built ONCE here, off the per-call forward path.
    # (Use compute_dtype=jnp.bfloat16 on v5e/v6e/v7x for ~2x HBM savings and
    #  the native bf16 MXU path; relax tolerances to ~1e-2 in that case.)
    fused = fuse_cgps_params(params, compute_dtype=jnp.float32)

    fwd = jax.jit(functools.partial(cgps_head_forward, fused=fused))
    cls_score, bbox_pred, id_pred = fwd(x1, x)
    jax.block_until_ready((cls_score, bbox_pred, id_pred))

    # sanity check against plain-JAX reference
    ref_cls, ref_reg, ref_id = reference_forward(x1, x, params)
    assert cls_score.shape == ref_cls.shape
    assert bbox_pred.shape == ref_reg.shape
    assert id_pred.shape == ref_id.shape
    assert jnp.allclose(cls_score, ref_cls, atol=1e-5, rtol=1e-5)
    assert jnp.allclose(bbox_pred, ref_reg, atol=1e-5, rtol=1e-5)
    assert jnp.allclose(id_pred, ref_id, atol=1e-5, rtol=1e-5)

    print("KERNEL_OK")
</pallas_src>

<mosaic_0001>
module attributes {stable_mosaic.version = 11 : i64} {
  func.func @_cgps_head_kernel(%arg0: i32, %arg1: memref<304x256xf32, #tpu.memory_space<vmem>>, %arg2: memref<304x128xf32, #tpu.memory_space<vmem>>, %arg3: memref<256x256xf32, #tpu.memory_space<vmem>>, %arg4: memref<1x256xf32, #tpu.memory_space<vmem>>, %arg5: memref<128x128xf32, #tpu.memory_space<vmem>>, %arg6: memref<1x128xf32, #tpu.memory_space<vmem>>, %arg7: memref<304x256xf32, #tpu.memory_space<vmem>>, %arg8: memref<304x128xf32, #tpu.memory_space<vmem>>) attributes {dimension_semantics = [#tpu.dimension_semantics<parallel>], iteration_bounds = array<i64: 1>, scalar_prefetch = 0 : i64, scratch_operands = 0 : i64, tpu.core_type = #tpu.core_type<tc>, window_params = [{transform_indices = @transform_0, window_bounds = array<i64: 304, 256>}, {transform_indices = @transform_1, window_bounds = array<i64: 304, 128>}, {pipeline_mode = #tpu.pipeline_mode<synchronous>, transform_indices = @transform_2, window_bounds = array<i64: 256, 256>}, {pipeline_mode = #tpu.pipeline_mode<synchronous>, transform_indices = @transform_3, window_bounds = array<i64: 1, 256>}, {pipeline_mode = #tpu.pipeline_mode<synchronous>, transform_indices = @transform_4, window_bounds = array<i64: 128, 128>}, {pipeline_mode = #tpu.pipeline_mode<synchronous>, transform_indices = @transform_5, window_bounds = array<i64: 1, 128>}, {transform_indices = @transform_6, window_bounds = array<i64: 304, 256>}, {transform_indices = @transform_7, window_bounds = array<i64: 304, 128>}]} {
    %c0 = arith.constant 0 : index
    %c0_0 = arith.constant 0 : index
    %0 = vector.load %arg1[%c0, %c0_0] : memref<304x256xf32, #tpu.memory_space<vmem>>, vector<304x256xf32>
    %c0_1 = arith.constant 0 : index
    %c0_2 = arith.constant 0 : index
    %1 = vector.load %arg2[%c0_1, %c0_2] : memref<304x128xf32, #tpu.memory_space<vmem>>, vector<304x128xf32>
    %c0_3 = arith.constant 0 : index
    %c0_4 = arith.constant 0 : index
    %2 = vector.load %arg3[%c0_3, %c0_4] : memref<256x256xf32, #tpu.memory_space<vmem>>, vector<256x256xf32>
    %cst = arith.constant dense<0.000000e+00> : vector<304x256xf32>
    %3 = tpu.matmul %0, %2, %cst {dimension_numbers = #tpu.dot_dimension_numbers<[1], [0], [0], [1], [0, 0, 1, 1], [], []>} : vector<304x256xf32>, vector<256x256xf32>, vector<304x256xf32> -> vector<304x256xf32>
    %c0_5 = arith.constant 0 : index
    %c0_6 = arith.constant 0 : index
    %4 = vector.load %arg4[%c0_5, %c0_6] : memref<1x256xf32, #tpu.memory_space<vmem>>, vector<1x256xf32>
    %5 = vector.broadcast %4 : vector<1x256xf32> to vector<304x256xf32>
    %6 = arith.addf %3, %5 : vector<304x256xf32>
    %c0_7 = arith.constant 0 : index
    %c0_8 = arith.constant 0 : index
    %7 = vector.load %arg5[%c0_7, %c0_8] : memref<128x128xf32, #tpu.memory_space<vmem>>, vector<128x128xf32>
    %cst_9 = arith.constant dense<0.000000e+00> : vector<304x128xf32>
    %8 = tpu.matmul %1, %7, %cst_9 {dimension_numbers = #tpu.dot_dimension_numbers<[1], [0], [0], [1], [0, 0, 1, 1], [], []>} : vector<304x128xf32>, vector<128x128xf32>, vector<304x128xf32> -> vector<304x128xf32>
    %c0_10 = arith.constant 0 : index
    %c0_11 = arith.constant 0 : index
    %9 = vector.load %arg6[%c0_10, %c0_11] : memref<1x128xf32, #tpu.memory_space<vmem>>, vector<1x128xf32>
    %10 = vector.broadcast %9 : vector<1x128xf32> to vector<304x128xf32>
    %11 = arith.addf %8, %10 : vector<304x128xf32>
    %12 = vector.extract_strided_slice %6 {offsets = [0, 0], sizes = [304, 128], strides = [1, 1]} : vector<304x256xf32> to vector<304x128xf32>
    %13 = vector.extract_strided_slice %6 {offsets = [0, 128], sizes = [304, 128], strides = [1, 1]} : vector<304x256xf32> to vector<304x128xf32>
    %14 = arith.mulf %12, %12 : vector<304x128xf32>
    %cst_12 = arith.constant dense<0.000000e+00> : vector<304xf32>
    %15 = vector.multi_reduction <add>, %14, %cst_12 [1] : vector<304x128xf32> to vector<304xf32>
    %16 = vector.shape_cast %15 : vector<304xf32> to vector<304x1xf32>
    %17 = arith.mulf %11, %11 : vector<304x128xf32>
    %cst_13 = arith.constant dense<0.000000e+00> : vector<304xf32>
    %18 = vector.multi_reduction <add>, %17, %cst_13 [1] : vector<304x128xf32> to vector<304xf32>
    %19 = vector.shape_cast %18 : vector<304xf32> to vector<304x1xf32>
    %20 = arith.addf %16, %19 : vector<304x1xf32>
    %cst_14 = arith.constant 1.000000e-24 : f32
    %21 = vector.broadcast %cst_14 : f32 to vector<304x1xf32>
    %22 = arith.maximumf %20, %21 : vector<304x1xf32>
    %23 = math.rsqrt %22 : vector<304x1xf32>
    %24 = vector.broadcast %23 : vector<304x1xf32> to vector<304x128xf32>
    %25 = arith.mulf %12, %24 : vector<304x128xf32>
    %c0_15 = arith.constant 0 : index
    %c0_16 = arith.constant 0 : index
    %26 = vector.load %arg7[%c0_15, %c0_16] : memref<304x256xf32, #tpu.memory_space<vmem>>, vector<304x128xf32>
    tpu.vector_store %arg7[%c0_15, %c0_16], %25 {strides = array<i32>} : memref<304x256xf32, #tpu.memory_space<vmem>>, vector<304x128xf32>,
    %27 = vector.broadcast %23 : vector<304x1xf32> to vector<304x128xf32>
    %28 = arith.mulf %11, %27 : vector<304x128xf32>
    %c0_17 = arith.constant 0 : index
    %c128 = arith.constant 128 : index
    %29 = vector.load %arg7[%c0_17, %c128] : memref<304x256xf32, #tpu.memory_space<vmem>>, vector<304x128xf32>
    tpu.vector_store %arg7[%c0_17, %c128], %28 {strides = array<i32>} : memref<304x256xf32, #tpu.memory_space<vmem>>, vector<304x128xf32>,
    %c0_18 = arith.constant 0 : index
    %c0_19 = arith.constant 0 : index
    %30 = vector.load %arg8[%c0_18, %c0_19] : memref<304x128xf32, #tpu.memory_space<vmem>>, vector<304x128xf32>
    tpu.vector_store %arg8[%c0_18, %c0_19], %13 {strides = array<i32>} : memref<304x128xf32, #tpu.memory_space<vmem>>, vector<304x128xf32>,
    return
  }
  func.func @transform_0(%arg0: i32) -> (i32, i32) {
    %c0_i32 = arith.constant 0 : i32
    %c0_i32_0 = arith.constant 0 : i32
    return %arg0, %c0_i32 : i32, i32
  }
  func.func @transform_1(%arg0: i32) -> (i32, i32) {
    %c0_i32 = arith.constant 0 : i32
    %c0_i32_0 = arith.constant 0 : i32
    return %arg0, %c0_i32 : i32, i32
  }
  func.func @transform_2(%arg0: i32) -> (i32, i32) {
    %c0_i32 = arith.constant 0 : i32
    %c0_i32_0 = arith.constant 0 : i32
    %c0_i32_1 = arith.constant 0 : i32
    return %c0_i32, %c0_i32_0 : i32, i32
  }
  func.func @transform_3(%arg0: i32) -> (i32, i32) {
    %c0_i32 = arith.constant 0 : i32
    %c0_i32_0 = arith.constant 0 : i32
    %c0_i32_1 = arith.constant 0 : i32
    return %c0_i32, %c0_i32_0 : i32, i32
  }
  func.func @transform_4(%arg0: i32) -> (i32, i32) {
    %c0_i32 = arith.constant 0 : i32
    %c0_i32_0 = arith.constant 0 : i32
    %c0_i32_1 = arith.constant 0 : i32
    return %c0_i32, %c0_i32_0 : i32, i32
  }
  func.func @transform_5(%arg0: i32) -> (i32, i32) {
    %c0_i32 = arith.constant 0 : i32
    %c0_i32_0 = arith.constant 0 : i32
    %c0_i32_1 = arith.constant 0 : i32
    return %c0_i32, %c0_i32_0 : i32, i32
  }
  func.func @transform_6(%arg0: i32) -> (i32, i32) {
    %c0_i32 = arith.constant 0 : i32
    %c0_i32_0 = arith.constant 0 : i32
    return %arg0, %c0_i32 : i32, i32
  }
  func.func @transform_7(%arg0: i32) -> (i32, i32) {
    %c0_i32 = arith.constant 0 : i32
    %c0_i32_0 = arith.constant 0 : i32
    return %arg0, %c0_i32 : i32, i32
  }
}

</mosaic_0001>

<bundles_post_ra>
// kernel: cgps_head_forward.1
= control target key start
LH: loop header
LB: loop body
LE: loop exit
PB: predicated region body
PF: predicated region fallthrough
CT: control target
= control target key end

     0   :  { %s3756_s0 = inlined_call_operand.vmem [shape: f32[304,256], index: 0, kind: input, shape index: {}]   ;;  %s3757_s1 = inlined_call_operand.vmem [shape: f32[304,128], index: 1, kind: input, shape index: {}]   ;;  %s3758_s2 = inlined_call_operand.vmem [shape: f32[256,256], index: 2, kind: input, shape index: {}]   ;;  %s3759_s3 = inlined_call_operand.vmem [shape: f32[1,256], index: 3, kind: input, shape index: {}]   ;;  %s3760_s4 = inlined_call_operand.vmem [shape: f32[128,128], index: 4, kind: input, shape index: {}]   ;;  %s3761_s5 = inlined_call_operand.vmem [shape: f32[1,128], index: 5, kind: input, shape index: {}]   ;;  %s3762_s6 = inlined_call_operand.hbm [shape: f32[304,256], index: 6, kind: output, shape index: {0}]   ;;  %s3763_s7 = inlined_call_operand.vmem [shape: f32[304,128], index: 7, kind: output, shape index: {1}]  }
   0x1   :  { %v170_v0 = vld [vmem:[%s3758_s2 + $0xf0] sm:$0xff]  ;;  %v168_v1 = vld [vmem:[%s3758_s2 + $0xe0] sm:$0xff] }
   0x2   :  { %210 = vmatpush.msra.mxu0 %v170_v0  ;;  %1781 = vmatpush.msra.mxu1 %v170_v0  ;;  %v166_v2 = vld [vmem:[%s3758_s2 + $0xd0] sm:$0xff]  ;;  %v164_v3 = vld [vmem:[%s3758_s2 + $0xc0] sm:$0xff] }
   0x3   :  { %1782 = vmatpush.msra.mxu2 %v170_v0  ;;  %1783 = vmatpush.msra.mxu3 %v170_v0  ;;  %v162_v4 = vld [vmem:[%s3758_s2 + $0xb0] sm:$0xff] }
   0x4   :  { %211 = vmatpush.msra.mxu0 %v168_v1  ;;  %1784 = vmatpush.msra.mxu1 %v168_v1 }
   0x5   :  { %1785 = vmatpush.msra.mxu2 %v168_v1  ;;  %1786 = vmatpush.msra.mxu3 %v168_v1 }
   0x6   :  { %212 = vmatpush.msra.mxu0 %v166_v2  ;;  %1787 = vmatpush.msra.mxu1 %v166_v2 }
   0x7   :  { %1788 = vmatpush.msra.mxu2 %v166_v2  ;;  %1789 = vmatpush.msra.mxu3 %v166_v2 }
   0x8   :  { %213 = vmatpush.msra.mxu0 %v164_v3  ;;  %1790 = vmatpush.msra.mxu1 %v164_v3 }
   0x9   :  { %13 = vsyncpa [#allocation3], 0  ;;  %v160_v5 = vld [vmem:[%s3758_s2 + $0xa0] sm:$0xff]  ;;  %1791 = vmatpush.msra.mxu2 %v164_v3  ;;  %1792 = vmatpush.msra.mxu3 %v164_v3  ;;  %v158_v6 = vld [vmem:[%s3758_s2 + $0x90] sm:$0xff]  ;;  %s1765_s19 = sshll.u32 %s3762_s6, 4  ;;  %s1962_s20 = smov 16   ;;  %s1766_s19 = int_to_ptr.hbm [resolvable:$true] %s1765_s19 }
   0xa   :  { %214 = vmatpush.msra.mxu0 %v162_v4  ;;  %1793 = vmatpush.msra.mxu1 %v162_v4  ;;  %v156_v7 = vld [vmem:[%s3758_s2 + $0x80] sm:$0xff]  ;;  %v154_v8 = vld [vmem:[%s3758_s2 + $0x70] sm:$0xff]  ;;  %v749_v19 = vld [vmem:[%s3760_s4 + $0x78] sm:$0xff] }
   0xb   :  { %1794 = vmatpush.msra.mxu2 %v162_v4  ;;  %1795 = vmatpush.msra.mxu3 %v162_v4  ;;  %v152_v9 = vld [vmem:[%s3758_s2 + $0x60] sm:$0xff]  ;;  %v150_v10 = vld [vmem:[%s3758_s2 + $0x50] sm:$0xff]  ;;  %v747_v23 = vld [vmem:[%s3760_s4 + $0x68] sm:$0xff] }
   0xc   :  { %215 = vmatpush.msra.mxu0 %v160_v5  ;;  %1796 = vmatpush.msra.mxu1 %v160_v5  ;;  %v148_v11 = vld [vmem:[%s3758_s2 + $0x40] sm:$0xff]  ;;  %v146_v12 = vld [vmem:[%s3758_s2 + $0x30] sm:$0xff]  ;;  %v745_v29 = vld [vmem:[%s3760_s4 + $0x58] sm:$0xff] }
   0xd   :  { %1797 = vmatpush.msra.mxu2 %v160_v5  ;;  %1798 = vmatpush.msra.mxu3 %v160_v5  ;;  %v144_v13 = vld [vmem:[%s3758_s2 + $0x20] sm:$0xff]  ;;  %v142_v14 = vld [vmem:[%s3758_s2 + $0x10] sm:$0xff]  ;;  %v743_v33 = vld [vmem:[%s3760_s4 + $0x48] sm:$0xff] }
   0xe   :  { %216 = vmatpush.msra.mxu0 %v158_v6  ;;  %1799 = vmatpush.msra.mxu1 %v158_v6  ;;  %v140_v15 = vld [vmem:[%s3758_s2] sm:$0xff]  ;;  %v202_v18 = vld [vmem:[%s3758_s2 + $0x1f0] sm:$0xff]  ;;  %v741_v40 = vld [vmem:[%s3760_s4 + $0x38] sm:$0xff] }
   0xf   :  { %1800 = vmatpush.msra.mxu2 %v158_v6  ;;  %1801 = vmatpush.msra.mxu3 %v158_v6  ;;  %v2054_v16 = vld [vmem:[%s3756_s0] sm:$0xff]  ;;  %v748_v21 = vld [vmem:[%s3760_s4 + $0x70] sm:$0xff]  ;;  %v739_v46 = vld [vmem:[%s3760_s4 + $0x28] sm:$0xff] }
  0x10   :  { %217 = vmatpush.msra.mxu0 %v156_v7  ;;  %1802 = vmatpush.msra.mxu1 %v156_v7  ;;  %v2059_v17 = vld [vmem:[%s3756_s0 + $0xa0] sm:$0xff]  ;;  %v198_v22 = vld [vmem:[%s3758_s2 + $0x1d0] sm:$0xff]  ;;  %v737_v52 = vld [vmem:[%s3760_s4 + $0x18] sm:$0xff] }
  0x11   :  { %1803 = vmatpush.msra.mxu2 %v156_v7  ;;  %1804 = vmatpush.msra.mxu3 %v156_v7  ;;  %v200_v20 = vld [vmem:[%s3758_s2 + $0x1e0] sm:$0xff]  ;;  %v2090_v26 = vld [vmem:[%s3756_s0 + $0x10] sm:$0xff]  ;;  %v735_v58 = vld [vmem:[%s3760_s4 + $0x8] sm:$0xff] }
  0x12   :  { %218 = vmatpush.msra.mxu0 %v154_v8  ;;  %1805 = vmatpush.msra.mxu1 %v154_v8  ;;  %v196_v24 = vld [vmem:[%s3758_s2 + $0x1c0] sm:$0xff]  ;;  %v2095_v27 = vld [vmem:[%s3756_s0 + $0xb0] sm:$0xff]  ;;  %v2270_v4 = vld [vmem:[%s3756_s0 + $0x8] sm:$0xff] }
  0x13   :  { %1806 = vmatpush.msra.mxu2 %v154_v8  ;;  %1807 = vmatpush.msra.mxu3 %v154_v8  ;;  %v746_v25 = vld [vmem:[%s3760_s4 + $0x60] sm:$0xff]  ;;  %v194_v28 = vld [vmem:[%s3758_s2 + $0x1b0] sm:$0xff]  ;;  %v2279_v6 = vld [vmem:[%s3756_s0 + $0x18] sm:$0xff] }
  0x14   :  { %219 = vmatpush.msra.mxu0 %v152_v9  ;;  %1808 = vmatpush.msra.mxu1 %v152_v9  ;;  %v192_v30 = vld [vmem:[%s3758_s2 + $0x1a0] sm:$0xff]  ;;  %v744_v31 = vld [vmem:[%s3760_s4 + $0x50] sm:$0xff]  ;;  %v103_v7 = vld [vmem:[%s3757_s1 + $0x8] sm:$0xff] }
  0x15   :  { %1809 = vmatpush.msra.mxu2 %v152_v9  ;;  %1810 = vmatpush.msra.mxu3 %v152_v9  ;;  %v190_v32 = vld [vmem:[%s3758_s2 + $0x190] sm:$0xff]  ;;  %v188_v34 = vld [vmem:[%s3758_s2 + $0x180] sm:$0xff]  ;;  %v2288_v8 = vld [vmem:[%s3756_s0 + $0x28] sm:$0xff] }
  0x16   :  { %220 = vmatpush.msra.mxu0 %v150_v10  ;;  %1811 = vmatpush.msra.mxu1 %v150_v10  ;;  %v742_v35 = vld [vmem:[%s3760_s4 + $0x40] sm:$0xff]  ;;  %v186_v38 = vld [vmem:[%s3758_s2 + $0x170] sm:$0xff] }
  0x17   :  { %1812 = vmatpush.msra.mxu2 %v150_v10  ;;  %1813 = vmatpush.msra.mxu3 %v150_v10  ;;  %v2126_v36 = vld [vmem:[%s3756_s0 + $0x20] sm:$0xff]  ;;  %v740_v41 = vld [vmem:[%s3760_s4 + $0x30] sm:$0xff]  ;;  %v2297_v10 = vld [vmem:[%s3756_s0 + $0x38] sm:$0xff] }
  0x18   :  { %221 = vmatpush.msra.mxu0 %v148_v11  ;;  %1814 = vmatpush.msra.mxu1 %v148_v11  ;;  %v2131_v37 = vld [vmem:[%s3756_s0 + $0xc0] sm:$0xff]  ;;  %v182_v42 = vld [vmem:[%s3758_s2 + $0x150] sm:$0xff] }
  0x19   :  { %1815 = vmatpush.msra.mxu2 %v148_v11  ;;  %1816 = vmatpush.msra.mxu3 %v148_v11  ;;  %v184_v39 = vld [vmem:[%s3758_s2 + $0x160] sm:$0xff]  ;;  %v2156_v44 = vld [vmem:[%s3756_s0 + $0x30] sm:$0xff]  ;;  %v105_v11 = vld [vmem:[%s3757_s1 + $0x18] sm:$0xff] }
  0x1a   :  { %222 = vmatpush.msra.mxu0 %v146_v12  ;;  %1817 = vmatpush.msra.mxu1 %v146_v12  ;;  %v180_v43 = vld [vmem:[%s3758_s2 + $0x140] sm:$0xff]  ;;  %v2161_v45 = vld [vmem:[%s3756_s0 + $0xd0] sm:$0xff] }
  0x1b   :  { %1818 = vmatpush.msra.mxu2 %v146_v12  ;;  %1819 = vmatpush.msra.mxu3 %v146_v12  ;;  %v178_v47 = vld [vmem:[%s3758_s2 + $0x130] sm:$0xff]  ;;  %v738_v48 = vld [vmem:[%s3760_s4 + $0x20] sm:$0xff]  ;;  %v2306_v12 = vld [vmem:[%s3756_s0 + $0x48] sm:$0xff] }
  0x1c   :  { %223 = vmatpush.msra.mxu0 %v144_v13  ;;  %1820 = vmatpush.msra.mxu1 %v144_v13  ;;  %v2177_v49 = vld [vmem:[%s3756_s0 + $0x40] sm:$0xff]  ;;  %v174_v53 = vld [vmem:[%s3758_s2 + $0x110] sm:$0xff] }
  0x1d   :  { %1821 = vmatpush.msra.mxu2 %v144_v13  ;;  %1822 = vmatpush.msra.mxu3 %v144_v13  ;;  %v2182_v50 = vld [vmem:[%s3756_s0 + $0xe0] sm:$0xff]  ;;  %v2198_v54 = vld [vmem:[%s3756_s0 + $0x50] sm:$0xff] }
  0x1e   :  { %224 = vmatpush.msra.mxu0 %v142_v14  ;;  %1823 = vmatpush.msra.mxu1 %v142_v14  ;;  %v176_v51 = vld [vmem:[%s3758_s2 + $0x120] sm:$0xff]  ;;  %v2203_v55 = vld [vmem:[%s3756_s0 + $0xf0] sm:$0xff] }
  0x1f   :  { %1824 = vmatpush.msra.mxu2 %v142_v14  ;;  %1825 = vmatpush.msra.mxu3 %v142_v14  ;;  %v736_v56 = vld [vmem:[%s3760_s4 + $0x10] sm:$0xff]  ;;  %v172_v57 = vld [vmem:[%s3758_s2 + $0x100] sm:$0xff] }
  0x20   :  { %225 = vmatpush.msra.mxu0 %v140_v15  ;;  %1826 = vmatpush.msra.mxu1 %v140_v15  ;;  %v734_v59 = vld [vmem:[%s3760_s4] sm:$0xff]  ;;  %v2234_v62 = vld [vmem:[%s3756_s0 + $0x70] sm:$0xff] }
  0x21   :  { %226 = vmatmul.f32.vlgmr.msra.gmra.mxu0 %v2054_v16  ;;  %256 = vmatmul.f32.vlgmr.msra.gmra.mxu1 %v2059_v17  ;;  %v2222_v60 = vld [vmem:[%s3756_s0 + $0x60] sm:$0xff]  ;;  %v2239_v63 = vld [vmem:[%s3756_s0 + $0x110] sm:$0xff] }
  0x22   :  { %341 = vmatpush.msrb.mxu1 %v202_v18  ;;  %754 = vmatpush.msrb.mxu0 %v749_v19  ;;  %v2227_v61 = vld [vmem:[%s3756_s0 + $0x100] sm:$0xff]  ;;  %v2258_v2 = vld [vmem:[%s3756_s0 + $0x90] sm:$0xff]  ;;  %v169_v18 = vld [vmem:[%s3758_s2 + $0xe8] sm:$0xff] }
  0x23   :  { %1827 = vmatpush.msra.mxu2 %v140_v15  ;;  %1828 = vmatpush.msra.mxu3 %v140_v15  ;;  %v2246_v0 = vld [vmem:[%s3756_s0 + $0x80] sm:$0xff]  ;;  %v2263_v3 = vld [vmem:[%s3756_s0 + $0x130] sm:$0xff]  ;;  %v171_v15 = vld [vmem:[%s3758_s2 + $0xf8] sm:$0xff] }
  0x24   :  { %342 = vmatpush.msrb.mxu1 %v200_v20  ;;  %755 = vmatpush.msrb.mxu0 %v748_v21  ;;  %v2251_v1 = vld [vmem:[%s3756_s0 + $0x120] sm:$0xff]  ;;  %v104_v9 = vld [vmem:[%s3757_s1 + $0x10] sm:$0xff]  ;;  %v2324_v19 = vld [vmem:[%s3756_s0 + $0x58] sm:$0xff] }
  0x25   :  { %v102_v5 = vld [vmem:[%s3757_s1] sm:$0xff]  ;;  %472 = vmatpush.msrb.mxu2 %v171_v15  ;;  %v107_v20 = vld [vmem:[%s3757_s1 + $0x28] sm:$0xff]  ;;  %v68_v21 = vld [vmem:[%s3756_s0 + $0x150] sm:$0xff] }
  0x26   :  { %343 = vmatpush.msrb.mxu1 %v198_v22  ;;  %756 = vmatpush.msrb.mxu0 %v747_v23  ;;  %v106_v13 = vld [vmem:[%s3757_s1 + $0x20] sm:$0xff]  ;;  %v167_v22 = vld [vmem:[%s3758_s2 + $0xd8] sm:$0xff]  ;;  %v76_v15 = vld [vmem:[%s3756_s0 + $0x190] sm:$0xff] }
  0x27   :  { %v66_v14 = vld [vmem:[%s3756_s0 + $0x140] sm:$0xff]  ;;  %473 = vmatpush.msrb.mxu2 %v169_v18  ;;  %v155_v18 = vld [vmem:[%s3758_s2 + $0x78] sm:$0xff] }
  0x28   :  { %344 = vmatpush.msrb.mxu1 %v196_v24  ;;  %757 = vmatpush.msrb.mxu0 %v746_v25  ;;  %v2343_v25 = vld [vmem:[%s3756_s0 + $0x68] sm:$0xff] }
  0x29   :  { %229 = vmatmul.f32.gmra.mxu0 %v2090_v26  ;;  %259 = vmatmul.f32.gmra.mxu1 %v2095_v27 }
  0x2a   :  { %345 = vmatpush.msrb.mxu1 %v194_v28  ;;  %758 = vmatpush.msrb.mxu0 %v745_v29  ;;  %v108_v28 = vld [vmem:[%s3757_s1 + $0x30] sm:$0xff]  ;;  %v165_v29 = vld [vmem:[%s3758_s2 + $0xc8] sm:$0xff] }
  0x2b   :  { %286 = vmatmul.f32.vlgmr.msra.gmra.mxu2 %v66_v14  ;;  %v193_v14 = vld [vmem:[%s3758_s2 + $0x1a8] sm:$0xff] }
  0x2c   :  { %346 = vmatpush.msrb.mxu1 %v192_v30  ;;  %759 = vmatpush.msrb.mxu0 %v744_v31  ;;  %v70_v30 = vld [vmem:[%s3756_s0 + $0x160] sm:$0xff] }
  0x2d   :  { %474 = vmatpush.msrb.mxu2 %v167_v22  ;;  %v86_v31 = vld [vmem:[%s3756_s0 + $0x1e0] sm:$0xff]  ;;  %v153_v22 = vld [vmem:[%s3758_s2 + $0x68] sm:$0xff] }
  0x2e   :  { %347 = vmatpush.msrb.mxu1 %v190_v32  ;;  %760 = vmatpush.msrb.mxu0 %v743_v33  ;;  %v203_v32 = vld [vmem:[%s3758_s2 + $0x1f8] sm:$0xff] }
  0x2f   :  { %475 = vmatpush.msrb.mxu2 %v165_v29  ;;  %v163_v33 = vld [vmem:[%s3758_s2 + $0xb8] sm:$0xff]  ;;  %316 = vmatmul.f32.vlgmr.msra.gmra.mxu3 %v86_v31  ;;  %v112_v31 = vld [vmem:[%s3757_s1 + $0x50] sm:$0xff] }
  0x30   :  { %348 = vmatpush.msrb.mxu1 %v188_v34  ;;  %761 = vmatpush.msrb.mxu0 %v742_v35 }
  0x31   :  { %232 = vmatmul.f32.gmra.mxu0 %v2126_v36  ;;  %262 = vmatmul.f32.gmra.mxu1 %v2131_v37 }
  0x32   :  { %349 = vmatpush.msrb.mxu1 %v186_v38  ;;  %762 = vmatpush.msrb.mxu0 %v741_v40  ;;  %v2371_v38 = vld [vmem:[%s3756_s0 + $0x78] sm:$0xff]  ;;  %v201_v40 = vld [vmem:[%s3758_s2 + $0x1e8] sm:$0xff] }
  0x33   :  { %289 = vmatmul.f32.gmra.mxu2 %v68_v21  ;;  %603 = vmatpush.msrb.mxu3 %v203_v32  ;;  %v191_v21 = vld [vmem:[%s3758_s2 + $0x198] sm:$0xff]  ;;  %v189_v32 = vld [vmem:[%s3758_s2 + $0x188] sm:$0xff] }
  0x34   :  { %350 = vmatpush.msrb.mxu1 %v184_v39  ;;  %763 = vmatpush.msrb.mxu0 %v740_v41  ;;  %v109_v39 = vld [vmem:[%s3757_s1 + $0x38] sm:$0xff]  ;;  %v72_v41 = vld [vmem:[%s3756_s0 + $0x170] sm:$0xff] }
  0x35   :  { %476 = vmatpush.msrb.mxu2 %v163_v33  ;;  %604 = vmatpush.msrb.mxu3 %v201_v40  ;;  %v78_v33 = vld [vmem:[%s3756_s0 + $0x1a0] sm:$0xff]  ;;  %v151_v40 = vld [vmem:[%s3758_s2 + $0x58] sm:$0xff] }
  0x36   :  { %351 = vmatpush.msrb.mxu1 %v182_v42  ;;  %764 = vmatpush.msrb.mxu0 %v739_v46  ;;  %v161_v42 = vld [vmem:[%s3758_s2 + $0xa8] sm:$0xff]  ;;  %v199_v46 = vld [vmem:[%s3758_s2 + $0x1d8] sm:$0xff] }
  0x37   :  { %477 = vmatpush.msrb.mxu2 %v161_v42  ;;  %605 = vmatpush.msrb.mxu3 %v199_v46  ;;  %v2489_v46 = vld [vmem:[%s3756_s0 + $0xb8] sm:$0xff] }
  0x38   :  { %352 = vmatpush.msrb.mxu1 %v180_v43  ;;  %765 = vmatpush.msrb.mxu0 %v738_v48  ;;  %v88_v43 = vld [vmem:[%s3756_s0 + $0x1f0] sm:$0xff] }
  0x39   :  { %235 = vmatmul.f32.gmra.mxu0 %v2156_v44  ;;  %265 = vmatmul.f32.gmra.mxu1 %v2161_v45 }
  0x3a   :  { %353 = vmatpush.msrb.mxu1 %v178_v47  ;;  %766 = vmatpush.msrb.mxu0 %v737_v52  ;;  %v110_v52 = vld [vmem:[%s3757_s1 + $0x40] sm:$0xff] }
  0x3b   :  { %292 = vmatmul.f32.gmra.mxu2 %v70_v30  ;;  %319 = vmatmul.f32.gmra.mxu3 %v88_v43  ;;  %v2461_v30 = vld [vmem:[%s3756_s0 + $0xa8] sm:$0xff] }
  0x3c   :  { %354 = vmatpush.msrb.mxu1 %v176_v51  ;;  %767 = vmatpush.msrb.mxu0 %v736_v56  ;;  %v2399_v51 = vld [vmem:[%s3756_s0 + $0x88] sm:$0xff] }
  0x3d   :  { %v197_v56 = vld [vmem:[%s3758_s2 + $0x1c8] sm:$0xff] }
  0x3e   :  { %355 = vmatpush.msrb.mxu1 %v174_v53  ;;  %768 = vmatpush.msrb.mxu0 %v735_v58  ;;  %v159_v53 = vld [vmem:[%s3758_s2 + $0x98] sm:$0xff]  ;;  %v90_v58 = vld [vmem:[%s3756_s0 + $0x200] sm:$0xff] }
  0x3f   :  { %478 = vmatpush.msrb.mxu2 %v159_v53  ;;  %606 = vmatpush.msrb.mxu3 %v197_v56  ;;  %v185_v53 = vld [vmem:[%s3758_s2 + $0x168] sm:$0xff] }
  0x40   :  { %356 = vmatpush.msrb.mxu1 %v172_v57  ;;  %769 = vmatpush.msrb.mxu0 %v734_v59  ;;  %v74_v57 = vld [vmem:[%s3756_s0 + $0x180] sm:$0xff]  ;;  %v195_v59 = vld [vmem:[%s3758_s2 + $0x1b8] sm:$0xff]  ;;  %v149_v56 = vld [vmem:[%s3758_s2 + $0x48] sm:$0xff] }
  0x41   :  { %238 = vmatmul.f32.gmra.mxu0 %v2177_v49  ;;  %268 = vmatmul.f32.gmra.mxu1 %v2182_v50 }
  0x42   :  { %607 = vmatpush.msrb.mxu3 %v195_v59  ;;  %v183_v59 = vld [vmem:[%s3758_s2 + $0x158] sm:$0xff] }
  0x43   :  { %295 = vmatmul.f32.gmra.mxu2 %v72_v41  ;;  %322 = vmatmul.f32.gmra.mxu3 %v90_v58  ;;  %v187_v41 = vld [vmem:[%s3758_s2 + $0x178] sm:$0xff]  ;;  %v96_v58 = vld [vmem:[%s3756_s0 + $0x230] sm:$0xff] }
  0x44   :  { %608 = vmatpush.msrb.mxu3 %v193_v14 }
  0x46   :  { %609 = vmatpush.msrb.mxu3 %v191_v21  ;;  %v82_v21 = vld [vmem:[%s3756_s0 + $0x1c0] sm:$0xff] }
  0x48   :  { %610 = vmatpush.msrb.mxu3 %v189_v32  ;;  %v179_v32 = vld [vmem:[%s3758_s2 + $0x138] sm:$0xff] }
  0x49   :  { %241 = vmatmul.f32.gmra.mxu0 %v2198_v54  ;;  %271 = vmatmul.f32.gmra.mxu1 %v2203_v55 }
  0x4a   :  { %611 = vmatpush.msrb.mxu3 %v187_v41  ;;  %v115_v41 = vld [vmem:[%s3757_s1 + $0x68] sm:$0xff] }
  0x4b   :  { %298 = vmatmul.f32.gmra.mxu2 %v74_v57  ;;  %v80_v57 = vld [vmem:[%s3756_s0 + $0x1b0] sm:$0xff] }
  0x4c   :  { %612 = vmatpush.msrb.mxu3 %v185_v53  ;;  %v177_v53 = vld [vmem:[%s3758_s2 + $0x128] sm:$0xff] }
  0x4e   :  { %613 = vmatpush.msrb.mxu3 %v183_v59  ;;  %v141_v59 = vld [vmem:[%s3758_s2 + $0x8] sm:$0xff] }
  0x51   :  { %244 = vmatmul.f32.gmra.mxu0 %v2222_v60  ;;  %274 = vmatmul.f32.gmra.mxu1 %v2227_v61 }
  0x53   :  { %301 = vmatmul.f32.gmra.mxu2 %v76_v15  ;;  %v2520_v15 = vld [vmem:[%s3756_s0 + $0xc8] sm:$0xff] }
  0x59   :  { %247 = vmatmul.f32.gmra.mxu0 %v2234_v62  ;;  %277 = vmatmul.f32.gmra.mxu1 %v2239_v63 }
  0x5b   :  { %304 = vmatmul.f32.gmra.mxu2 %v78_v33 }
  0x61   :  { %250 = vmatmul.f32.gmra.mxu0 %v2246_v0  ;;  %280 = vmatmul.f32.gmra.mxu1 %v2251_v1 }
  0x63   :  { %307 = vmatmul.f32.gmra.mxu2 %v80_v57  ;;  %v100_v57 = vld [vmem:[%s3756_s0 + $0x250] sm:$0xff] }
  0x69   :  { %253 = vmatmul.f32.gmra.mxu0 %v2258_v2  ;;  %283 = vmatmul.f32.gmra.mxu1 %v2263_v3 }
  0x6b   :  { %310 = vmatmul.f32.gmra.mxu2 %v82_v21  ;;  %v116_v21 = vld [vmem:[%s3757_s1 + $0x70] sm:$0xff] }
  0x71   :  { %357 = vmatmul.f32.vlgmr.msrb.gmra.mxu1 %v2270_v4  ;;  %770 = vmatmul.f32.vlgmr.msrb.gmra.mxu0 %v102_v5  ;;  %v157_v5 = vld [vmem:[%s3758_s2 + $0x88] sm:$0xff] }
  0x72   :  { %479 = vmatpush.msrb.mxu2 %v157_v5  ;;  %v147_v5 = vld [vmem:[%s3758_s2 + $0x38] sm:$0xff] }
  0x74   :  { %480 = vmatpush.msrb.mxu2 %v155_v18  ;;  %v114_v18 = vld [vmem:[%s3757_s1 + $0x60] sm:$0xff] }
  0x76   :  { %481 = vmatpush.msrb.mxu2 %v153_v22  ;;  %v145_v22 = vld [vmem:[%s3758_s2 + $0x28] sm:$0xff] }
  0x78   :  { %482 = vmatpush.msrb.mxu2 %v151_v40  ;;  %v2548_v40 = vld [vmem:[%s3756_s0 + $0xd8] sm:$0xff] }
  0x79   :  { %360 = vmatmul.f32.gmra.mxu1 %v2279_v6  ;;  %773 = vmatmul.f32.gmra.mxu0 %v103_v7 }
  0x7a   :  { %483 = vmatpush.msrb.mxu2 %v149_v56  ;;  %v84_v56 = vld [vmem:[%s3756_s0 + $0x1d0] sm:$0xff] }
  0x7b   :  { %313 = vmatmul.f32.gmra.mxu2 %v84_v56 }
  0x7c   :  { %484 = vmatpush.msrb.mxu2 %v147_v5 }
  0x7e   :  { %485 = vmatpush.msrb.mxu2 %v145_v22  ;;  %v173_v22 = vld [vmem:[%s3758_s2 + $0x108] sm:$0xff] }
  0x81   :  { %363 = vmatmul.f32.gmra.mxu1 %v2288_v8  ;;  %776 = vmatmul.f32.gmra.mxu0 %v104_v9 }
  0x89   :  { %366 = vmatmul.f32.gmra.mxu1 %v2297_v10  ;;  %779 = vmatmul.f32.gmra.mxu0 %v105_v11  ;;  %v2430_v11 = vld [vmem:[%s3756_s0 + $0x98] sm:$0xff] }
  0x91   :  { %369 = vmatmul.f32.gmra.mxu1 %v2306_v12  ;;  %782 = vmatmul.f32.gmra.mxu0 %v106_v13  ;;  %v111_v13 = vld [vmem:[%s3757_s1 + $0x48] sm:$0xff] }
  0x99   :  { %372 = vmatmul.f32.gmra.mxu1 %v2324_v19  ;;  %785 = vmatmul.f32.gmra.mxu0 %v107_v20  ;;  %v92_v20 = vld [vmem:[%s3756_s0 + $0x210] sm:$0xff] }
  0x9a   :  { %325 = vmatmul.f32.gmra.mxu3 %v92_v20  ;;  %v181_v20 = vld [vmem:[%s3758_s2 + $0x148] sm:$0xff] }
  0x9b   :  { %614 = vmatpush.msrb.mxu3 %v181_v20  ;;  %v2579_v20 = vld [vmem:[%s3756_s0 + $0xe8] sm:$0xff] }
  0x9d   :  { %615 = vmatpush.msrb.mxu3 %v179_v32 }
  0x9e   :  { %v2336_v23 = vpop.f32.mrf.mxu0  ;;  %v2338_v24 = vpop.f32.mrf.mxu1 }
  0x9f   :  { %616 = vmatpush.msrb.mxu3 %v177_v53  ;;  %v2605_v53 = vld [vmem:[%s3759_s3] sm:$0x3]  ;;  %s1961_s3 = smov 256  }
  0xa1   :  { %375 = vmatmul.f32.gmra.mxu1 %v2343_v25  ;;  %788 = vmatmul.f32.gmra.mxu0 %v108_v28 }
  0xa6   :  { %v2364_v34 = vpop.f32.mrf.mxu0  ;;  %v2366_v35 = vpop.f32.mrf.mxu1 }
  0xa9   :  { %378 = vmatmul.f32.gmra.mxu1 %v2371_v38  ;;  %791 = vmatmul.f32.gmra.mxu0 %v109_v39  ;;  %v94_v39 = vld [vmem:[%s3756_s0 + $0x220] sm:$0xff] }
  0xaa   :  { %328 = vmatmul.f32.gmra.mxu3 %v94_v39 }
  0xae   :  { %v2392_v47 = vpop.f32.mrf.mxu0  ;;  %v2394_v48 = vpop.f32.mrf.mxu1 }
  0xb1   :  { %381 = vmatmul.f32.gmra.mxu1 %v2399_v51  ;;  %794 = vmatmul.f32.gmra.mxu0 %v110_v52  ;;  %v113_v52 = vld [vmem:[%s3757_s1 + $0x58] sm:$0xff] }
  0xb2   :  { %331 = vmatmul.f32.gmra.mxu3 %v96_v58  ;;  %v175_v58 = vld [vmem:[%s3758_s2 + $0x118] sm:$0xff] }
  0xb3   :  { %617 = vmatpush.msrb.mxu3 %v175_v58 }
  0xb5   :  { %618 = vmatpush.msrb.mxu3 %v173_v22 }
  0xb6   :  { %v2423_v7 = vpop.f32.mrf.mxu0  ;;  %v2425_v9 = vpop.f32.mrf.mxu1 }
  0xb9   :  { %384 = vmatmul.f32.gmra.mxu1 %v2430_v11  ;;  %797 = vmatmul.f32.gmra.mxu0 %v111_v13 }
  0xbe   :  { %v2454_v28 = vpop.f32.mrf.mxu0  ;;  %v2456_v29 = vpop.f32.mrf.mxu1 }
  0xc1   :  { %387 = vmatmul.f32.gmra.mxu1 %v2461_v30  ;;  %800 = vmatmul.f32.gmra.mxu0 %v112_v31  ;;  %v98_v31 = vld [vmem:[%s3756_s0 + $0x240] sm:$0xff] }
  0xc2   :  { %334 = vmatmul.f32.gmra.mxu3 %v98_v31 }
  0xc6   :  { %v2482_v42 = vpop.f32.mrf.mxu0  ;;  %v2484_v43 = vpop.f32.mrf.mxu1 }
  0xc9   :  { %390 = vmatmul.f32.gmra.mxu1 %v2489_v46  ;;  %803 = vmatmul.f32.gmra.mxu0 %v113_v52  ;;  %v143_v52 = vld [vmem:[%s3758_s2 + $0x18] sm:$0xff] }
  0xca   :  { %486 = vmatpush.msrb.mxu2 %v143_v52  ;;  %337 = vmatmul.f32.gmra.mxu3 %v100_v57  ;;  %v117_v52 = vld [vmem:[%s3757_s1 + $0x78] sm:$0xff] }
  0xcc   :  { %487 = vmatpush.msrb.mxu2 %v141_v59  ;;  %v2623_v59 = vld [vmem:[%s3756_s0 + $0x108] sm:$0xff] }
  0xcd   :  { %488 = vmatmul.f32.vlgmr.msrb.gmra.mxu2 %v2054_v16  ;;  %v2611_v16 = vperm.slane %v2605_v53, 0 }
  0xce   :  { %v2513_v13 = vpop.f32.mrf.mxu0  ;;  %v2515_v14 = vpop.f32.mrf.mxu1 }
  0xcf   :  { %v228_v56 = vadd.f32 %v2336_v23, %v2611_v16 }
  0xd1   :  { %393 = vmatmul.f32.gmra.mxu1 %v2520_v15  ;;  %806 = vmatmul.f32.gmra.mxu0 %v114_v18 }
  0xd2   :  { %619 = vmatmul.f32.vlgmr.msrb.gmra.mxu3 %v2270_v4  ;;  %v2616_v4 = vld [vmem:[%s3761_s5] ss:$0 sm:$0xff] }
  0xd5   :  { %491 = vmatmul.f32.gmra.mxu2 %v2090_v26  ;;  %v118_v26 = vld [vmem:[%s3757_s1 + $0x80] sm:$0xff] }
  0xd6   :  { %v2541_v33 = vpop.f32.mrf.mxu0  ;;  %v2543_v39 = vpop.f32.mrf.mxu1 }
  0xd9   :  { %396 = vmatmul.f32.gmra.mxu1 %v2548_v40  ;;  %809 = vmatmul.f32.gmra.mxu0 %v115_v41  ;;  %v2597_v41 = vld [vmem:[%s3756_s0 + $0xf8] sm:$0xff] }
  0xda   :  { %622 = vmatmul.f32.gmra.mxu3 %v2279_v6 }
  0xdd   :  { %494 = vmatmul.f32.gmra.mxu2 %v2126_v36 }
  0xde   :  { %v2572_v5 = vpop.f32.mrf.mxu0  ;;  %v2574_v18 = vpop.f32.mrf.mxu1 }
  0xe1   :  { %399 = vmatmul.f32.gmra.mxu1 %v2579_v20  ;;  %812 = vmatmul.f32.gmra.mxu0 %v116_v21 }
  0xe2   :  { %625 = vmatmul.f32.gmra.mxu3 %v2288_v8 }
  0xe5   :  { %497 = vmatmul.f32.gmra.mxu2 %v2156_v44  ;;  %v120_v44 = vld [vmem:[%s3757_s1 + $0x90] sm:$0xff] }
  0xe6   :  { %v2590_v31 = vpop.f32.mrf.mxu0  ;;  %v2592_v32 = vpop.f32.mrf.mxu1 }
  0xe7   :  { %3781 = vst [vmem:[#allocation5_spill] sm:$0xff] %v2592_v32 }
  0xe9   :  { %402 = vmatmul.f32.gmra.mxu1 %v2597_v41  ;;  %815 = vmatmul.f32.gmra.mxu0 %v117_v52  ;;  %v231_v52 = vadd.f32 %v2364_v34, %v2611_v16  ;;  %v234_v34 = vadd.f32 %v2392_v47, %v2611_v16 }
  0xea   :  { %628 = vmatmul.f32.gmra.mxu3 %v2297_v10 }
  0xed   :  { %500 = vmatmul.f32.gmra.mxu2 %v2177_v49 }
  0xee   :  { %v358_v57 = vpop.f32.mrf.mxu1  ;;  %v771_v58 = vpop.f32.mrf.mxu0 }
  0xef   :  { %v2628_v6 = vadd.f32 %v358_v57, %v228_v56  ;;  %v2631_v21 = vadd.f32 %v2616_v4, %v771_v58  ;;  %v2645_v58 = vld [vmem:[%s3756_s0 + $0x118] sm:$0xff] }
  0xf1   :  { %405 = vmatmul.f32.gmra.mxu1 %v2623_v59  ;;  %818 = vmatmul.f32.gmra.mxu0 %v118_v26  ;;  %v999_v23 = vmul.f32 %v2631_v21, %v2631_v21  ;;  %v885_v22 = vmul.f32 %v2628_v6, %v2628_v6  ;;  %v119_v26 = vld [vmem:[%s3757_s1 + $0x88] sm:$0xff] }
  0xf2   :  { %631 = vmatmul.f32.gmra.mxu3 %v2306_v12 }
  0xf3   :  { %1037 = vadd.xlane.f32.xlu2 %v999_v23  ;;  %923 = vadd.xlane.f32.xlu0 %v885_v22 }
  0xf5   :  { %503 = vmatmul.f32.gmra.mxu2 %v2198_v54  ;;  %v122_v54 = vld [vmem:[%s3757_s1 + $0xa0] sm:$0xff] }
  0xf6   :  { %v361_v56 = vpop.f32.mrf.mxu1  ;;  %v774_v57 = vpop.f32.mrf.mxu0 }
  0xf7   :  { %v2650_v32 = vadd.f32 %v361_v56, %v231_v52  ;;  %v2658_v8 = vadd.f32 %v2616_v4, %v774_v57  ;;  %v2665_v52 = vld [vmem:[%s3756_s0 + $0x128] sm:$0xff] }
  0xf9   :  { %408 = vmatmul.f32.gmra.mxu1 %v2645_v58  ;;  %821 = vmatmul.f32.gmra.mxu0 %v119_v26  ;;  %v886_v36 = vmul.f32 %v2650_v32, %v2650_v32  ;;  %v1000_v10 = vmul.f32 %v2658_v8, %v2658_v8 }
  0xfa   :  { %634 = vmatmul.f32.gmra.mxu3 %v2324_v19 }
  0xfb   :  { %925 = vadd.xlane.f32.xlu0 %v886_v36 }
  0xfd   :  { %506 = vmatmul.f32.gmra.mxu2 %v2222_v60  ;;  %v123_v60 = vld [vmem:[%s3757_s1 + $0xa8] sm:$0xff] }
  0xfe   :  { %v364_v23 = vpop.f32.mrf.mxu1  ;;  %v777_v22 = vpop.f32.mrf.mxu0 }
  0xff   :  { %v2670_v56 = vadd.f32 %v364_v23, %v234_v34  ;;  %v2680_v57 = vadd.f32 %v2616_v4, %v777_v22  ;;  %v2685_v34 = vld [vmem:[%s3756_s0 + $0x138] sm:$0xff] }
 0x100   :  { %v121_v23 = vld [vmem:[%s3757_s1 + $0x98] sm:$0xff] }
 0x101   :  { %411 = vmatmul.f32.gmra.mxu1 %v2665_v52  ;;  %824 = vmatmul.f32.gmra.mxu0 %v120_v44  ;;  %v887_v47 = vmul.f32 %v2670_v56, %v2670_v56  ;;  %3782 = vst [vmem:[#allocation6_spill] sm:$0xff] %v2680_v57  ;;  %v1001_v12 = vmul.f32 %v2680_v57, %v2680_v57 }
 0x102   :  { %v237_v44 = vadd.f32 %v2423_v7, %v2611_v16  ;;  %637 = vmatmul.f32.gmra.mxu3 %v2343_v25 }
 0x103   :  { %927 = vadd.xlane.f32.xlu1 %v887_v47  ;;  %1039 = vadd.xlane.f32.xlu0 %v1000_v10  ;;  %v240_v10 = vadd.f32 %v2454_v28, %v2611_v16 }
 0x105   :  { %509 = vmatmul.f32.gmra.mxu2 %v2234_v62  ;;  %v124_v62 = vld [vmem:[%s3757_s1 + $0xb0] sm:$0xff] }
 0x106   :  { %v367_v26 = vpop.f32.mrf.mxu1  ;;  %v780_v36 = vpop.f32.mrf.mxu0 }
 0x107   :  { %v2691_v49 = vadd.f32 %v2616_v4, %v780_v36  ;;  %v2704_v47 = vadd.f32 %v367_v26, %v237_v44 }
 0x109   :  { %414 = vmatmul.f32.gmra.mxu1 %v2685_v34  ;;  %827 = vmatmul.f32.gmra.mxu0 %v121_v23  ;;  %v1002_v22 = vmul.f32 %v2691_v49, %v2691_v49  ;;  %v2709_v23 = vld [vmem:[%s3756_s0 + $0x148] sm:$0xff]  ;;  %v888_v26 = vmul.f32 %v2704_v47, %v2704_v47 }
 0x10a   :  { %640 = vmatmul.f32.gmra.mxu3 %v2371_v38 }
 0x10b   :  { %1043 = vadd.xlane.f32.xlu2 %v1002_v22  ;;  %1041 = vadd.xlane.f32.xlu1 %v1001_v12  ;;  %v243_v22 = vadd.f32 %v2482_v42, %v2611_v16 }
 0x10d   :  { %512 = vmatmul.f32.gmra.mxu2 %v2246_v0  ;;  %v125_v0 = vld [vmem:[%s3757_s1 + $0xb8] sm:$0xff] }
 0x10e   :  { %v370_v36 = vpop.f32.mrf.mxu1  ;;  %v783_v57 = vpop.f32.mrf.mxu0 }
 0x10f   :  { %v2714_v19 = vadd.f32 %v370_v36, %v240_v10  ;;  %v2717_v7 = vadd.f32 %v2616_v4, %v783_v57  ;;  %v2728_v57 = vpop.f32.mrf.mxu2  ;;  %v2735_v36 = vld [vmem:[%s3756_s0 + $0x158] sm:$0xff] }
 0x111   :  { %417 = vmatmul.f32.gmra.mxu1 %v2709_v23  ;;  %830 = vmatmul.f32.gmra.mxu0 %v122_v54  ;;  %v889_v28 = vmul.f32 %v2714_v19, %v2714_v19  ;;  %v1003_v12 = vmul.f32 %v2717_v7, %v2717_v7 }
 0x112   :  { %643 = vmatmul.f32.gmra.mxu3 %v2399_v51 }
 0x113   :  { %931 = vadd.xlane.f32.xlu2 %v889_v28  ;;  %929 = vadd.xlane.f32.xlu1 %v888_v26 }
 0x114   :  { %1045 = vadd.xlane.f32.xlu0 %v1003_v12  ;;  %v246_v12 = vadd.f32 %v2513_v13, %v2611_v16 }
 0x115   :  { %515 = vmatmul.f32.gmra.mxu2 %v2258_v2  ;;  %v126_v2 = vld [vmem:[%s3757_s1 + $0xc0] sm:$0xff] }
 0x116   :  { %v373_v44 = vpop.f32.mrf.mxu1  ;;  %v786_v10 = vpop.f32.mrf.mxu0 }
 0x117   :  { %v2740_v25 = vadd.f32 %v373_v44, %v243_v22  ;;  %v2743_v54 = vadd.f32 %v2616_v4, %v786_v10  ;;  %v2752_v26 = vpop.f32.mrf.mxu2  ;;  %v2759_v10 = vld [vmem:[%s3756_s0 + $0x168] sm:$0xff] }
 0x119   :  { %420 = vmatmul.f32.gmra.mxu1 %v2735_v36  ;;  %833 = vmatmul.f32.gmra.mxu0 %v123_v60  ;;  %v890_v42 = vmul.f32 %v2740_v25, %v2740_v25  ;;  %v1004_v28 = vmul.f32 %v2743_v54, %v2743_v54 }
 0x11a   :  { %646 = vmatmul.f32.gmra.mxu3 %v2430_v11 }
 0x11b   :  { %933 = vadd.xlane.f32.xlu2 %v890_v42  ;;  %1047 = vadd.xlane.f32.xlu1 %v1004_v28  ;;  %v249_v28 = vadd.f32 %v2541_v33, %v2611_v16 }
 0x11d   :  { %518 = vmatmul.f32.gmra.mxu2 %v2059_v17  ;;  %v127_v17 = vld [vmem:[%s3757_s1 + $0xc8] sm:$0xff] }
 0x11e   :  { %v376_v22 = vpop.f32.mrf.mxu1  ;;  %v789_v44 = vpop.f32.mrf.mxu0 }
 0x11f   :  { %v2764_v60 = vadd.f32 %v376_v22, %v246_v12  ;;  %v2767_v38 = vadd.f32 %v2616_v4, %v789_v44  ;;  %v2778_v12 = vpop.f32.mrf.mxu2  ;;  %v2780_v22 = vpop.f32.mrf.mxu3 }
 0x120   :  { %3784 = vst [vmem:[#allocation8_spill] sm:$0xff] %v2780_v22 }
 0x121   :  { %3783 = vst [vmem:[#allocation7_spill] sm:$0xff] %v2767_v38  ;;  %423 = vmatmul.f32.gmra.mxu1 %v2759_v10  ;;  %836 = vmatmul.f32.gmra.mxu0 %v124_v62  ;;  %v1005_v13 = vmul.f32 %v2767_v38, %v2767_v38  ;;  %v891_v42 = vmul.f32 %v2764_v60, %v2764_v60  ;;  %v2785_v38 = vld [vmem:[%s3756_s0 + $0x178] sm:$0xff] }
 0x122   :  { %649 = vmatmul.f32.gmra.mxu3 %v2461_v30 }
 0x123   :  { %1049 = vadd.xlane.f32.xlu2 %v1005_v13  ;;  %935 = vadd.xlane.f32.xlu0 %v891_v42 }
 0x125   :  { %521 = vmatmul.f32.gmra.mxu2 %v2095_v27  ;;  %v128_v27 = vld [vmem:[%s3757_s1 + $0xd0] sm:$0xff] }
 0x126   :  { %v379_v44 = vpop.f32.mrf.mxu1  ;;  %v792_v62 = vpop.f32.mrf.mxu0 }
 0x127   :  { %v2790_v51 = vadd.f32 %v379_v44, %v249_v28  ;;  %v2793_v13 = vadd.f32 %v2616_v4, %v792_v62  ;;  %v252_v28 = vadd.f32 %v2572_v5, %v2611_v16  ;;  %v2804_v44 = vpop.f32.mrf.mxu2  ;;  %v2806_v62 = vpop.f32.mrf.mxu3 }
 0x128   :  { %3786 = vst [vmem:[#allocation10_spill] sm:$0xff] %v2806_v62 }
 0x129   :  { %3785 = vst [vmem:[#allocation9_spill] sm:$0xff] %v2790_v51  ;;  %426 = vmatmul.f32.gmra.mxu1 %v2785_v38  ;;  %839 = vmatmul.f32.gmra.mxu0 %v125_v0  ;;  %v892_v33 = vmul.f32 %v2790_v51, %v2790_v51  ;;  %v1006_v42 = vmul.f32 %v2793_v13, %v2793_v13  ;;  %v2811_v51 = vld [vmem:[%s3756_s0 + $0x188] sm:$0xff] }
 0x12a   :  { %652 = vmatmul.f32.gmra.mxu3 %v2489_v46 }
 0x12b   :  { %937 = vadd.xlane.f32.xlu1 %v892_v33  ;;  %1051 = vadd.xlane.f32.xlu0 %v1006_v42 }
 0x12d   :  { %524 = vmatmul.f32.gmra.mxu2 %v2131_v37  ;;  %v129_v37 = vld [vmem:[%s3757_s1 + $0xd8] sm:$0xff] }
 0x12e   :  { %v382_v0 = vpop.f32.mrf.mxu1  ;;  %v795_v22 = vpop.f32.mrf.mxu0 }
 0x12f   :  { %v2816_v11 = vadd.f32 %v382_v0, %v252_v28  ;;  %v2819_v33 = vadd.f32 %v2616_v4, %v795_v22  ;;  %v255_v28 = vadd.f32 %v2590_v31, %v2611_v16  ;;  %v2830_v22 = vpop.f32.mrf.mxu2  ;;  %v2832_v0 = vpop.f32.mrf.mxu3 }
 0x130   :  { %3788 = vst [vmem:[#allocation12_spill] sm:$0xff] %v2832_v0 }
 0x131   :  { %3787 = vst [vmem:[#allocation11_spill] sm:$0xff] %v2816_v11  ;;  %429 = vmatmul.f32.gmra.mxu1 %v2811_v51  ;;  %842 = vmatmul.f32.gmra.mxu0 %v126_v2  ;;  %v893_v5 = vmul.f32 %v2816_v11, %v2816_v11  ;;  %v1007_v42 = vmul.f32 %v2819_v33, %v2819_v33  ;;  %v2837_v11 = vld [vmem:[%s3756_s0 + $0x198] sm:$0xff] }
 0x132   :  { %655 = vmatmul.f32.gmra.mxu3 %v2520_v15 }
 0x133   :  { %939 = vadd.xlane.f32.xlu2 %v893_v5  ;;  %1053 = vadd.xlane.f32.xlu1 %v1007_v42 }
 0x135   :  { %527 = vmatmul.f32.gmra.mxu2 %v2161_v45  ;;  %v130_v45 = vld [vmem:[%s3757_s1 + $0xe0] sm:$0xff] }
 0x136   :  { %v385_v2 = vpop.f32.mrf.mxu1  ;;  %v798_v62 = vpop.f32.mrf.mxu0 }
 0x137   :  { %v2842_v30 = vadd.f32 %v385_v2, %v255_v28  ;;  %v2845_v5 = vadd.f32 %v2616_v4, %v798_v62  ;;  %v258_v28 = vadd.f32 %v2338_v24, %v2611_v16  ;;  %v2856_v62 = vpop.f32.mrf.mxu2  ;;  %v2858_v2 = vpop.f32.mrf.mxu3 }
 0x138   :  { %3790 = vst [vmem:[#allocation14_spill] sm:$0xff] %v2858_v2 }
 0x139   :  { %3789 = vst [vmem:[#allocation13_spill] sm:$0xff] %v2845_v5  ;;  %432 = vmatmul.f32.gmra.mxu1 %v2837_v11  ;;  %845 = vmatmul.f32.gmra.mxu0 %v127_v17  ;;  %v1008_v31 = vmul.f32 %v2845_v5, %v2845_v5  ;;  %v894_v42 = vmul.f32 %v2842_v30, %v2842_v30  ;;  %v2863_v5 = vld [vmem:[%s3756_s0 + $0x1a8] sm:$0xff] }
 0x13a   :  { %658 = vmatmul.f32.gmra.mxu3 %v2548_v40 }
 0x13b   :  { %1055 = vadd.xlane.f32.xlu2 %v1008_v31  ;;  %941 = vadd.xlane.f32.xlu0 %v894_v42 }
 0x13d   :  { %530 = vmatmul.f32.gmra.mxu2 %v2182_v50  ;;  %v131_v50 = vld [vmem:[%s3757_s1 + $0xe8] sm:$0xff] }
 0x13e   :  { %v388_v17 = vpop.f32.mrf.mxu1  ;;  %v801_v0 = vpop.f32.mrf.mxu0 }
 0x13f   :  { %v2868_v46 = vadd.f32 %v388_v17, %v258_v28  ;;  %v2871_v31 = vadd.f32 %v2616_v4, %v801_v0  ;;  %v261_v28 = vadd.f32 %v2366_v35, %v2611_v16  ;;  %v2882_v0 = vpop.f32.mrf.mxu2  ;;  %v2884_v17 = vpop.f32.mrf.mxu3 }
 0x140   :  { %3792 = vst [vmem:[#allocation16_spill] sm:$0xff] %v2884_v17 }
 0x141   :  { %3791 = vst [vmem:[#allocation15_spill] sm:$0xff] %v2868_v46  ;;  %435 = vmatmul.f32.gmra.mxu1 %v2863_v5  ;;  %848 = vmatmul.f32.gmra.mxu0 %v128_v27  ;;  %v895_v24 = vmul.f32 %v2868_v46, %v2868_v46  ;;  %v1009_v42 = vmul.f32 %v2871_v31, %v2871_v31  ;;  %v2889_v46 = vld [vmem:[%s3756_s0 + $0x1b8] sm:$0xff] }
 0x142   :  { %661 = vmatmul.f32.gmra.mxu3 %v2579_v20 }
 0x143   :  { %943 = vadd.xlane.f32.xlu1 %v895_v24  ;;  %1057 = vadd.xlane.f32.xlu0 %v1009_v42 }
 0x145   :  { %533 = vmatmul.f32.gmra.mxu2 %v2203_v55  ;;  %v132_v55 = vld [vmem:[%s3757_s1 + $0xf0] sm:$0xff] }
 0x146   :  { %v391_v27 = vpop.f32.mrf.mxu1  ;;  %v804_v2 = vpop.f32.mrf.mxu0 }
 0x147   :  { %v2894_v15 = vadd.f32 %v391_v27, %v261_v28  ;;  %v2897_v24 = vadd.f32 %v2616_v4, %v804_v2  ;;  %v264_v28 = vadd.f32 %v2394_v48, %v2611_v16  ;;  %v2908_v2 = vpop.f32.mrf.mxu2 }
 0x149   :  { %3793 = vst [vmem:[#allocation17_spill] sm:$0xff] %v2894_v15  ;;  %438 = vmatmul.f32.gmra.mxu1 %v2889_v46  ;;  %851 = vmatmul.f32.gmra.mxu0 %v129_v37  ;;  %v896_v35 = vmul.f32 %v2894_v15, %v2894_v15  ;;  %v1010_v42 = vmul.f32 %v2897_v24, %v2897_v24  ;;  %v2913_v37 = vld [vmem:[%s3756_s0 + $0x1c8] sm:$0xff] }
 0x14a   :  { %3794 = vst [vmem:[#allocation18_spill] sm:$0xff] %v2897_v24  ;;  %664 = vmatmul.f32.gmra.mxu3 %v2597_v41 }
 0x14b   :  { %945 = vadd.xlane.f32.xlu2 %v896_v35  ;;  %1059 = vadd.xlane.f32.xlu1 %v1010_v42  ;;  %v2923_v35 = vpop.f32.mrf.mxu3 }
 0x14c   :  { %3797 = vst [vmem:[#allocation21_spill] sm:$0xff] %v2923_v35 }
 0x14d   :  { %536 = vmatmul.f32.gmra.mxu2 %v2227_v61  ;;  %v133_v61 = vld [vmem:[%s3757_s1 + $0xf8] sm:$0xff] }
 0x14e   :  { %v394_v27 = vpop.f32.mrf.mxu1  ;;  %v807_v17 = vpop.f32.mrf.mxu0 }
 0x14f   :  { %v2918_v24 = vadd.f32 %v394_v27, %v264_v28  ;;  %v2921_v40 = vadd.f32 %v2616_v4, %v807_v17  ;;  %v267_v17 = vadd.f32 %v2425_v9, %v2611_v16  ;;  %v2934_v28 = vpop.f32.mrf.mxu2 }
 0x151   :  { %3795 = vst [vmem:[#allocation19_spill] sm:$0xff] %v2918_v24  ;;  %441 = vmatmul.f32.gmra.mxu1 %v2913_v37  ;;  %854 = vmatmul.f32.gmra.mxu0 %v130_v45  ;;  %v1011_v48 = vmul.f32 %v2921_v40, %v2921_v40  ;;  %v897_v42 = vmul.f32 %v2918_v24, %v2918_v24  ;;  %v2939_v45 = vld [vmem:[%s3756_s0 + $0x1d8] sm:$0xff] }
 0x152   :  { %3796 = vst [vmem:[#allocation20_spill] sm:$0xff] %v2921_v40  ;;  %667 = vmatmul.f32.gmra.mxu3 %v2623_v59 }
 0x153   :  { %1061 = vadd.xlane.f32.xlu2 %v1011_v48  ;;  %947 = vadd.xlane.f32.xlu0 %v897_v42  ;;  %v2949_v48 = vpop.f32.mrf.mxu3 }
 0x154   :  { %3800 = vst [vmem:[#allocation24_spill] sm:$0xff] %v2949_v48 }
 0x155   :  { %539 = vmatmul.f32.gmra.mxu2 %v2239_v63  ;;  %v134_v63 = vld [vmem:[%s3757_s1 + $0x100] sm:$0xff] }
 0x156   :  { %v397_v27 = vpop.f32.mrf.mxu1  ;;  %v810_v35 = vpop.f32.mrf.mxu0 }
 0x157   :  { %v2944_v40 = vadd.f32 %v397_v27, %v267_v17  ;;  %v2947_v20 = vadd.f32 %v2616_v4, %v810_v35  ;;  %v270_v35 = vadd.f32 %v2456_v29, %v2611_v16  ;;  %v2960_v17 = vpop.f32.mrf.mxu2 }
 0x158   :  { %3801 = vst [vmem:[#allocation25_spill] sm:$0xff] %v2960_v17 }
 0x159   :  { %3798 = vst [vmem:[#allocation22_spill] sm:$0xff] %v2944_v40  ;;  %444 = vmatmul.f32.gmra.mxu1 %v2939_v45  ;;  %857 = vmatmul.f32.gmra.mxu0 %v131_v50  ;;  %v898_v9 = vmul.f32 %v2944_v40, %v2944_v40  ;;  %v1012_v42 = vmul.f32 %v2947_v20, %v2947_v20  ;;  %v2965_v50 = vld [vmem:[%s3756_s0 + $0x1e8] sm:$0xff] }
 0x15a   :  { %3799 = vst [vmem:[#allocation23_spill] sm:$0xff] %v2947_v20  ;;  %670 = vmatmul.f32.gmra.mxu3 %v2645_v58 }
 0x15b   :  { %949 = vadd.xlane.f32.xlu1 %v898_v9  ;;  %1063 = vadd.xlane.f32.xlu0 %v1012_v42  ;;  %v2975_v9 = vpop.f32.mrf.mxu3 }
 0x15c   :  { %3804 = vst [vmem:[#allocation28_spill] sm:$0xff] %v2975_v9 }
 0x15d   :  { %542 = vmatmul.f32.gmra.mxu2 %v2251_v1  ;;  %v135_v1 = vld [vmem:[%s3757_s1 + $0x108] sm:$0xff] }
 0x15e   :  { %v400_v27 = vpop.f32.mrf.mxu1  ;;  %v813_v48 = vpop.f32.mrf.mxu0 }
 0x15f   :  { %v2970_v20 = vadd.f32 %v400_v27, %v270_v35  ;;  %v2973_v41 = vadd.f32 %v2616_v4, %v813_v48  ;;  %v2985_v48 = vperm.slane %v2605_v53, 1  ;;  %v273_v35 = vadd.f32 %v2484_v43, %v2611_v16  ;;  %v489_v27 = vpop.f32.mrf.mxu2 }
 0x161   :  { %3802 = vst [vmem:[#allocation26_spill] sm:$0xff] %v2970_v20  ;;  %447 = vmatmul.f32.gmra.mxu1 %v2965_v50  ;;  %860 = vmatmul.f32.gmra.mxu0 %v132_v55  ;;  %v899_v29 = vmul.f32 %v2970_v20, %v2970_v20  ;;  %v1013_v42 = vmul.f32 %v2973_v41, %v2973_v41  ;;  %v2992_v20 = vld [vmem:[%s3756_s0 + $0x1f8] sm:$0xff] }
 0x162   :  { %3803 = vst [vmem:[#allocation27_spill] sm:$0xff] %v2973_v41  ;;  %v490_v59 = vadd.f32 %v489_v27, %v2985_v48  ;;  %673 = vmatmul.f32.gmra.mxu3 %v2665_v52 }
 0x163   :  { %951 = vadd.xlane.f32.xlu2 %v899_v29  ;;  %1065 = vadd.xlane.f32.xlu1 %v1013_v42  ;;  %v620_v40 = vpop.f32.mrf.mxu3 }
 0x164   :  { %v621_v17 = vadd.f32 %v620_v40, %v490_v59  ;;  %v91_v40 = vld [vmem:[%s3756_s0 + $0x208] sm:$0xff] }
 0x165   :  { %545 = vmatmul.f32.gmra.mxu2 %v2263_v3 }
 0x166   :  { %v403_v55 = vpop.f32.mrf.mxu1  ;;  %v816_v9 = vpop.f32.mrf.mxu0  ;;  %1721 = vst [vmem:[%s3763_s7] sm:$0xff] %v621_v17 }
 0x167   :  { %v2998_v29 = vadd.f32 %v403_v55, %v273_v35  ;;  %v3001_v53 = vadd.f32 %v2616_v4, %v816_v9  ;;  %v1038_v43 = vpop.xlane.xlu2 %1037  ;;  %v924_v42 = vpop.xlane.xlu0 %923  ;;  %v276_v9 = vadd.f32 %v2515_v14, %v2611_v16 }
 0x168   :  { %v1113_v41 = vadd.f32 %v1038_v43, %v924_v42  ;;  %v492_v17 = vpop.f32.mrf.mxu2 }
 0x169   :  { %450 = vmatmul.f32.gmra.mxu1 %v2992_v20  ;;  %863 = vmatmul.f32.gmra.mxu0 %v133_v61  ;;  %v1014_v24 = vmul.f32 %v3001_v53, %v3001_v53  ;;  %v900_v15 = vmul.f32 %v2998_v29, %v2998_v29 }
 0x16a   :  { %v1151_v27 = vmax.f32 %v1113_v41, 1e-24  ;;  %v493_v41 = vadd.f32 %v492_v17, %v2985_v48  ;;  %v93_v17 = vld [vmem:[%s3756_s0 + $0x218] sm:$0xff]  ;;  %676 = vmatmul.f32.gmra.mxu3 %v2685_v34 }
 0x16b   :  { %1067 = vadd.xlane.f32.xlu2 %v1014_v24  ;;  %953 = vadd.xlane.f32.xlu0 %v900_v15  ;;  %v623_v59 = vpop.f32.mrf.mxu3 }
 0x16c   :  { %1833 = vrsqrt.f32 %v1151_v27  ;;  %v624_v42 = vadd.f32 %v623_v59, %v493_v41  ;;  %vm1195_vm1 = vweird.f32 %v1151_v27 }
 0x16e   :  { %v406_v35 = vpop.f32.mrf.mxu1  ;;  %v819_v55 = vpop.f32.mrf.mxu0  ;;  %1722 = vst [vmem:[%s3763_s7 + $0x8] sm:$0xff] %v624_v42 }
 0x16f   :  { %v3021_v58 = vadd.f32 %v406_v35, %v276_v9  ;;  %v3024_v15 = vadd.f32 %v2616_v4, %v819_v55  ;;  %v926_v24 = vpop.xlane.xlu0 %925  ;;  %v279_v35 = vadd.f32 %v2543_v39, %v2611_v16 }
 0x170   :  { %v495_v42 = vpop.f32.mrf.mxu2 }
 0x171   :  { %3805 = vst [vmem:[#allocation29_spill] sm:$0xff] %v3021_v58  ;;  %453 = vmatmul.f32.gmra.mxu1 %v91_v40  ;;  %866 = vmatmul.f32.gmra.mxu0 %v134_v63  ;;  %v901_v14 = vmul.f32 %v3021_v58, %v3021_v58  ;;  %v1015_v61 = vmul.f32 %v3024_v15, %v3024_v15 }
 0x172   :  { %3806 = vst [vmem:[#allocation30_spill] sm:$0xff] %v3024_v15  ;;  %v1834_v43 = vpop.eup %1833  ;;  %679 = vmatmul.f32.gmra.mxu3 %v2709_v23  ;;  %v97_v23 = vld [vmem:[%s3756_s0 + $0x238] sm:$0xff] }
 0x173   :  { %v1190_v9 = vmul.f32 %v1834_v43, %v1151_v27  ;;  %955 = vadd.xlane.f32.xlu1 %v901_v14  ;;  %1069 = vadd.xlane.f32.xlu0 %v1015_v61  ;;  %vm1196_vm0 = vweird.f32 %v1834_v43 }
 0x174   :  { %vm1197_vm2 = vmor %vm1195_vm1, %vm1196_vm0 }
 0x175   :  { %v1191_v55 = vmul.f32 %v1834_v43, %v1190_v9 }
 0x176   :  { %v409_v40 = vpop.f32.mrf.mxu1  ;;  %v822_v63 = vpop.f32.mrf.mxu0 }
 0x177   :  { %v1192_v52 = vmul.f32 0.5, %v1191_v55  ;;  %v3044_v41 = vadd.f32 %v409_v40, %v279_v35  ;;  %v3047_v14 = vadd.f32 %v2616_v4, %v822_v63  ;;  %v928_v61 = vpop.xlane.xlu1 %927  ;;  %v1040_v59 = vpop.xlane.xlu0 %1039  ;;  %v496_v35 = vadd.f32 %v495_v42, %v2985_v48 }
 0x178   :  { %v1114_v39 = vadd.f32 %v1040_v59, %v926_v24  ;;  %v626_v55 = vpop.f32.mrf.mxu3 }
 0x179   :  { %v1193_v9 = vsub.f32 1.5, %v1192_v52  ;;  %456 = vmatmul.f32.gmra.mxu1 %v93_v17  ;;  %869 = vmatmul.f32.gmra.mxu0 %v135_v1  ;;  %v902_v15 = vmul.f32 %v3044_v41, %v3044_v41  ;;  %v1016_v58 = vmul.f32 %v3047_v14, %v3047_v14  ;;  %v627_v63 = vadd.f32 %v626_v55, %v496_v35  ;;  %v136_v52 = vld [vmem:[%s3757_s1 + $0x110] sm:$0xff] }
 0x17a   :  { %v3054_v40 = vmax.f32 %v1114_v39, 1e-24  ;;  %v282_v17 = vadd.f32 %v2574_v18, %v2611_v16  ;;  %682 = vmatmul.f32.gmra.mxu3 %v2735_v36 }
 0x17b   :  { %v1194_v24 = vmul.f32 %v1834_v43, %v1193_v9  ;;  %957 = vadd.xlane.f32.xlu2 %v902_v15  ;;  %1071 = vadd.xlane.f32.xlu1 %v1016_v58  ;;  %1723 = vst [vmem:[%s3763_s7 + $0x10] sm:$0xff] %v627_v63  ;;  %v95_v58 = vld [vmem:[%s3756_s0 + $0x228] sm:$0xff] }
 0x17c   :  { %1835 = vrsqrt.f32 %v3054_v40  ;;  %vm1205_vm4 = vweird.f32 %v3054_v40 }
 0x17d   :  { %v1198_v1 = vsel %vm1197_vm2, %v1834_v43, %v1194_v24 }
 0x17e   :  { %v1569_v3 = vmul.f32 %v1198_v1, %v2628_v6  ;;  %v1645_v34 = vmul.f32 %v1198_v1, %v2631_v21  ;;  %v412_v27 = vpop.f32.mrf.mxu1  ;;  %v825_v15 = vpop.f32.mrf.mxu0 }
 0x17f   :  { %v3073_v18 = vadd.f32 %v412_v27, %v282_v17  ;;  %v3076_v43 = vadd.f32 %v2616_v4, %v825_v15  ;;  %v1044_v59 = vpop.xlane.xlu2 %1043  ;;  %v1042_v39 = vpop.xlane.xlu1 %1041 }
 0x180   :  { %1607 = vst [vmem:[#allocation2] sm:$0xff] %v1569_v3  ;;  %v1115_v6 = vadd.f32 %v1042_v39, %v928_v61  ;;  %v498_v21 = vpop.f32.mrf.mxu2  ;;  %v629_v55 = vpop.f32.mrf.mxu3  ;;  %v1909_v61 = vld [vmem:[%s3756_s0 + $0x140] sm:$0xff] }
 0x181   :  { %3807 = vst [vmem:[#allocation31_spill] sm:$0xff] %v3076_v43  ;;  %459 = vmatmul.f32.gmra.mxu1 %v95_v58  ;;  %872 = vmatmul.f32.gmra.mxu0 %v136_v52  ;;  %v1017_v42 = vmul.f32 %v3076_v43, %v3076_v43  ;;  %v903_v9 = vmul.f32 %v3073_v18, %v3073_v18  ;;  %v3808_v3 = vld [vmem:[#allocation5_spill] sm:$0xff]  ;;  %v137_v52 = vld [vmem:[%s3757_s1 + $0x118] sm:$0xff] }
 0x182   :  { %1683 = vst [vmem:[#allocation2 + $0x8] sm:$0xff] %v1645_v34  ;;  %v499_v35 = vadd.f32 %v498_v21, %v2985_v48  ;;  %v1836_v24 = vpop.eup %1835  ;;  %v3083_v63 = vmax.f32 %v1115_v6, 1e-24  ;;  %548 = vmatmul.f32.gmra.mxu2 %v1909_v61  ;;  %v285_v34 = vadd.f32 %v3808_v3, %v2611_v16  ;;  %685 = vmatmul.f32.gmra.mxu3 %v2759_v10 }
 0x183   :  { %v1200_v17 = vmul.f32 %v1836_v24, %v3054_v40  ;;  %1073 = vadd.xlane.f32.xlu2 %v1017_v42  ;;  %959 = vadd.xlane.f32.xlu0 %v903_v9  ;;  %vm1206_vm3 = vweird.f32 %v1836_v24  ;;  %v291_v10 = vadd.f32 %v2752_v26, %v2611_v16  ;;  %v139_v26 = vld [vmem:[%s3757_s1 + $0x128] sm:$0xff] }
 0x184   :  { %v630_v1 = vadd.f32 %v629_v55, %v499_v35  ;;  %1837 = vrsqrt.f32 %v3083_v63  ;;  %vm1207_vm5 = vmor %vm1205_vm4, %vm1206_vm3  ;;  %vm1215_vm7 = vweird.f32 %v3083_v63 }
 0x185   :  { %v1201_v27 = vmul.f32 %v1836_v24, %v1200_v17 }
 0x186   :  { %1724 = vst [vmem:[%s3763_s7 + $0x18] sm:$0xff] %v630_v1  ;;  %v415_v15 = vpop.f32.mrf.mxu1  ;;  %v828_v58 = vpop.f32.mrf.mxu0 }
 0x187   :  { %v1202_v39 = vmul.f32 0.5, %v1201_v27  ;;  %v3102_v6 = vadd.f32 %v415_v15, %v285_v34  ;;  %v3105_v21 = vadd.f32 %v2616_v4, %v828_v58  ;;  %v932_v42 = vpop.xlane.xlu2 %931  ;;  %v930_v9 = vpop.xlane.xlu1 %929 }
 0x188   :  { %v1116_v35 = vadd.f32 %v1044_v59, %v930_v9  ;;  %v1046_v55 = vpop.xlane.xlu0 %1045  ;;  %v501_v61 = vpop.f32.mrf.mxu2  ;;  %v1910_v59 = vld [vmem:[%s3756_s0 + $0x150] sm:$0xff]  ;;  %v288_v9 = vadd.f32 %v2728_v57, %v2611_v16 }
 0x189   :  { %v1203_v17 = vsub.f32 1.5, %v1202_v39  ;;  %v1117_v1 = vadd.f32 %v1046_v55, %v932_v42  ;;  %462 = vmatmul.f32.gmra.mxu1 %v97_v23  ;;  %875 = vmatmul.f32.gmra.mxu0 %v137_v52  ;;  %v904_v3 = vmul.f32 %v3102_v6, %v3102_v6  ;;  %v1018_v34 = vmul.f32 %v3105_v21, %v3105_v21  ;;  %v632_v27 = vpop.f32.mrf.mxu3 }
 0x18a   :  { %v1838_v15 = vpop.eup %1837  ;;  %v3111_v58 = vmax.f32 %v1116_v35, 1e-24  ;;  %v502_v43 = vadd.f32 %v501_v61, %v2985_v48  ;;  %551 = vmatmul.f32.gmra.mxu2 %v1910_v59  ;;  %688 = vmatmul.f32.gmra.mxu3 %v2785_v38  ;;  %v294_v38 = vadd.f32 %v2778_v12, %v2611_v16 }
 0x18b   :  { %v1204_v23 = vmul.f32 %v1836_v24, %v1203_v17  ;;  %v1210_v52 = vmul.f32 %v1838_v15, %v3083_v63  ;;  %v3120_v39 = vmax.f32 %v1117_v1, 1e-24  ;;  %961 = vadd.xlane.f32.xlu1 %v904_v3  ;;  %1075 = vadd.xlane.f32.xlu0 %v1018_v34  ;;  %v99_v1 = vld [vmem:[%s3756_s0 + $0x248] sm:$0xff]  ;;  %vm1216_vm6 = vweird.f32 %v1838_v15 }
 0x18c   :  { %1839 = vrsqrt.f32 %v3111_v58  ;;  %v633_v42 = vadd.f32 %v632_v27, %v502_v43  ;;  %v138_v43 = vld [vmem:[%s3757_s1 + $0x120] sm:$0xff]  ;;  %vm1217_vm8 = vmor %vm1215_vm7, %vm1216_vm6  ;;  %vm1225_vm11 = vweird.f32 %v3111_v58 }
 0x18d   :  { %v1208_v35 = vsel %vm1207_vm5, %v1836_v24, %v1204_v23  ;;  %v1211_v55 = vmul.f32 %v1838_v15, %v1210_v52  ;;  %1841 = vrsqrt.f32 %v3120_v39  ;;  %vm1235_vm13 = vweird.f32 %v3120_v39 }
 0x18e   :  { %v1570_v36 = vmul.f32 %v1208_v35, %v2650_v32  ;;  %v1646_v40 = vmul.f32 %v1208_v35, %v2658_v8  ;;  %v418_v61 = vpop.f32.mrf.mxu1  ;;  %v831_v17 = vpop.f32.mrf.mxu0  ;;  %1725 = vst [vmem:[%s3763_s7 + $0x20] sm:$0xff] %v633_v42 }
 0x18f   :  { %v1212_v57 = vmul.f32 0.5, %v1211_v55  ;;  %v3138_v24 = vadd.f32 %v418_v61, %v288_v9  ;;  %v3141_v32 = vadd.f32 %v2616_v4, %v831_v17  ;;  %v934_v8 = vpop.xlane.xlu2 %933  ;;  %v1048_v3 = vpop.xlane.xlu1 %1047 }
 0x190   :  { %1608 = vst [vmem:[#allocation2 + $0x10] sm:$0xff] %v1570_v36  ;;  %v1118_v34 = vadd.f32 %v1048_v3, %v934_v8  ;;  %v504_v27 = vpop.f32.mrf.mxu2  ;;  %v1911_v36 = vld [vmem:[%s3756_s0 + $0x160] sm:$0xff]  ;;  %v3809_v3 = vld [vmem:[#allocation6_spill] sm:$0xff] }
 0x191   :  { %1684 = vst [vmem:[#allocation2 + $0x18] sm:$0xff] %v1646_v40  ;;  %v1213_v59 = vsub.f32 1.5, %v1212_v57  ;;  %465 = vmatmul.f32.gmra.mxu1 %v99_v1  ;;  %878 = vmatmul.f32.gmra.mxu0 %v138_v43  ;;  %v905_v23 = vmul.f32 %v3138_v24, %v3138_v24  ;;  %v1019_v52 = vmul.f32 %v3141_v32, %v3141_v32  ;;  %v635_v42 = vpop.f32.mrf.mxu3 }
 0x192   :  { %v3147_v9 = vpop.eup %1839  ;;  %v3149_v35 = vmax.f32 %v1118_v34, 1e-24  ;;  %v505_v55 = vadd.f32 %v504_v27, %v2985_v48  ;;  %554 = vmatmul.f32.gmra.mxu2 %v1911_v36  ;;  %691 = vmatmul.f32.gmra.mxu3 %v2811_v51 }
 0x193   :  { %v3156_v40 = vpop.eup %1841  ;;  %v1214_v61 = vmul.f32 %v1838_v15, %v1213_v59  ;;  %v1220_v17 = vmul.f32 %v3147_v9, %v3111_v58  ;;  %963 = vadd.xlane.f32.xlu2 %v905_v23  ;;  %1077 = vadd.xlane.f32.xlu1 %v1019_v52  ;;  %v101_v52 = vld [vmem:[%s3756_s0 + $0x258] sm:$0xff]  ;;  %vm1226_vm9 = vweird.f32 %v3147_v9 }
 0x194   :  { %v1230_v1 = vmul.f32 %v3156_v40, %v3120_v39  ;;  %1843 = vrsqrt.f32 %v3149_v35  ;;  %v636_v8 = vadd.f32 %v635_v42, %v505_v55  ;;  %vm1236_vm10 = vweird.f32 %v3156_v40  ;;  %vm1227_vm12 = vmor %vm1225_vm11, %vm1226_vm9 }
 0x195   :  { %v1218_v43 = vsel %vm1217_vm8, %v1838_v15, %v1214_v61  ;;  %v1221_v57 = vmul.f32 %v3147_v9, %v1220_v17  ;;  %vm1237_vm14 = vmor %vm1235_vm13, %vm1236_vm10  ;;  %vm1245_vm0 = vweird.f32 %v3149_v35 }
 0x196   :  { %v1571_v63 = vmul.f32 %v1218_v43, %v2670_v56  ;;  %v1647_v34 = vmul.f32 %v1218_v43, %v3809_v3  ;;  %v1231_v27 = vmul.f32 %v3156_v40, %v1230_v1  ;;  %v421_v59 = vpop.f32.mrf.mxu1  ;;  %v834_v23 = vpop.f32.mrf.mxu0  ;;  %1726 = vst [vmem:[%s3763_s7 + $0x28] sm:$0xff] %v636_v8 }
 0x197   :  { %v1222_v15 = vmul.f32 0.5, %v1221_v57  ;;  %v3177_v36 = vadd.f32 %v421_v59, %v291_v10  ;;  %v3180_v42 = vadd.f32 %v2616_v4, %v834_v23  ;;  %v1050_v56 = vpop.xlane.xlu2 %1049  ;;  %v936_v55 = vpop.xlane.xlu0 %935 }
 0x198   :  { %1609 = vst [vmem:[#allocation2 + $0x20] sm:$0xff] %v1571_v63  ;;  %v1232_v61 = vmul.f32 0.5, %v1231_v27  ;;  %v1119_v17 = vadd.f32 %v1050_v56, %v936_v55  ;;  %v507_v1 = vpop.f32.mrf.mxu2 }
 0x199   :  { %1685 = vst [vmem:[#allocation2 + $0x28] sm:$0xff] %v1647_v34  ;;  %v1223_v43 = vsub.f32 1.5, %v1222_v15  ;;  %468 = vmatmul.f32.gmra.mxu1 %v101_v52  ;;  %881 = vmatmul.f32.gmra.mxu0 %v139_v26  ;;  %v1020_v10 = vmul.f32 %v3180_v42, %v3180_v42  ;;  %v906_v57 = vmul.f32 %v3177_v36, %v3177_v36  ;;  %v638_v3 = vpop.f32.mrf.mxu3  ;;  %v1912_v34 = vld [vmem:[%s3756_s0 + $0x170] sm:$0xff] }
 0x19a   :  { %v1844_v59 = vpop.eup %1843  ;;  %v1233_v23 = vsub.f32 1.5, %v1232_v61  ;;  %v3191_v8 = vmax.f32 %v1119_v17, 1e-24  ;;  %v508_v63 = vadd.f32 %v507_v1, %v2985_v48  ;;  %557 = vmatmul.f32.gmra.mxu2 %v1912_v34  ;;  %694 = vmatmul.f32.gmra.mxu3 %v2837_v11 }
 0x19b   :  { %v1224_v27 = vmul.f32 %v3147_v9, %v1223_v43  ;;  %v1240_v52 = vmul.f32 %v1844_v59, %v3149_v35  ;;  %1079 = vadd.xlane.f32.xlu2 %v1020_v10  ;;  %965 = vadd.xlane.f32.xlu0 %v906_v57  ;;  %vm1246_vm15 = vweird.f32 %v1844_v59 }
 0x19c   :  { %v1234_v26 = vmul.f32 %v3156_v40, %v1233_v23  ;;  %1845 = vrsqrt.f32 %v3191_v8  ;;  %v639_v15 = vadd.f32 %v638_v3, %v508_v63  ;;  %vm1247_vm1 = vmor %vm1245_vm0, %vm1246_vm15  ;;  %vm1255_vm3 = vweird.f32 %v3191_v8 }
 0x19d   :  { %v1228_v56 = vsel %vm1227_vm12, %v3147_v9, %v1224_v27  ;;  %v1241_v58 = vmul.f32 %v1844_v59, %v1240_v52 }
 0x19e   :  { %v1572_v55 = vmul.f32 %v1228_v56, %v2704_v47  ;;  %v1648_v61 = vmul.f32 %v1228_v56, %v2691_v49  ;;  %v1238_v17 = vsel %vm1237_vm14, %v3156_v40, %v1234_v26  ;;  %v424_v1 = vpop.f32.mrf.mxu1  ;;  %v837_v39 = vpop.f32.mrf.mxu0  ;;  %1727 = vst [vmem:[%s3763_s7 + $0x30] sm:$0xff] %v639_v15  ;;  %v297_v56 = vadd.f32 %v2804_v44, %v2611_v16 }
 0x19f   :  { %v1573_v12 = vmul.f32 %v1238_v17, %v2714_v19  ;;  %v1649_v9 = vmul.f32 %v1238_v17, %v2717_v7  ;;  %v1242_v43 = vmul.f32 0.5, %v1241_v58  ;;  %v3219_v10 = vadd.f32 %v424_v1, %v294_v38  ;;  %v938_v57 = vpop.xlane.xlu1 %937  ;;  %v1052_v3 = vpop.xlane.xlu0 %1051 }
 0x1a0   :  { %1610 = vst [vmem:[#allocation2 + $0x30] sm:$0xff] %v1572_v55  ;;  %v3222_v49 = vadd.f32 %v2616_v4, %v837_v39  ;;  %v1120_v47 = vadd.f32 %v1052_v3, %v938_v57  ;;  %v510_v40 = vpop.f32.mrf.mxu2  ;;  %v1913_v4 = vld [vmem:[%s3756_s0 + $0x180] sm:$0xff] }
 0x1a1   :  { %1686 = vst [vmem:[#allocation2 + $0x38] sm:$0xff] %v1648_v61  ;;  %v1243_v23 = vsub.f32 1.5, %v1242_v43  ;;  %v907_v63 = vmul.f32 %v3219_v10, %v3219_v10  ;;  %v511_v19 = vadd.f32 %v510_v40, %v2985_v48  ;;  %v641_v7 = vpop.f32.mrf.mxu3 }
 0x1a2   :  { %v1846_v34 = vpop.eup %1845  ;;  %1611 = vst [vmem:[#allocation2 + $0x40] sm:$0xff] %v1573_v12  ;;  %v3227_v27 = vmax.f32 %v1120_v47, 1e-24  ;;  %v1021_v52 = vmul.f32 %v3222_v49, %v3222_v49  ;;  %560 = vmatmul.f32.gmra.mxu2 %v1913_v4  ;;  %v3251_v12 = vld [vmem:[%s3761_s5] ss:$0 sm:$0xff]  ;;  %697 = vmatmul.f32.gmra.mxu3 %v2863_v5 }
 0x1a3   :  { %1687 = vst [vmem:[#allocation2 + $0x48] sm:$0xff] %v1649_v9  ;;  %v1244_v26 = vmul.f32 %v1844_v59, %v1243_v23  ;;  %v1250_v15 = vmul.f32 %v1846_v34, %v3191_v8  ;;  %967 = vadd.xlane.f32.xlu1 %v907_v63  ;;  %v642_v38 = vadd.f32 %v641_v7, %v511_v19  ;;  %vm1256_vm2 = vweird.f32 %v1846_v34  ;;  %v1915_v19 = vld [vmem:[%s3756_s0 + $0x190] sm:$0xff]  ;;  %v3811_v5 = vld [vmem:[#allocation9_spill] sm:$0xff] }
 0x1a4   :  { %1847 = vrsqrt.f32 %v3227_v27  ;;  %1081 = vadd.xlane.f32.xlu0 %v1021_v52  ;;  %vm1257_vm4 = vmor %vm1255_vm3, %vm1256_vm2  ;;  %v3810_v8 = vld [vmem:[#allocation7_spill] sm:$0xff]  ;;  %vm1265_vm6 = vweird.f32 %v3227_v27 }
 0x1a5   :  { %v1248_v58 = vsel %vm1247_vm1, %v1844_v59, %v1244_v26  ;;  %v1251_v55 = vmul.f32 %v1846_v34, %v1250_v15  ;;  %1728 = vst [vmem:[%s3763_s7 + $0x38] sm:$0xff] %v642_v38  ;;  %v300_v26 = vadd.f32 %v2830_v22, %v2611_v16 }
 0x1a6   :  { %v1574_v51 = vmul.f32 %v1248_v58, %v2740_v25  ;;  %v1650_v35 = vmul.f32 %v1248_v58, %v2743_v54  ;;  %v427_v61 = vpop.f32.mrf.mxu1  ;;  %v840_v17 = vpop.f32.mrf.mxu0 }
 0x1a7   :  { %v1252_v1 = vmul.f32 0.5, %v1251_v55  ;;  %v3246_v39 = vadd.f32 %v427_v61, %v297_v56  ;;  %v3254_v44 = vadd.f32 %v3251_v12, %v840_v17  ;;  %v940_v59 = vpop.xlane.xlu2 %939  ;;  %v1054_v9 = vpop.xlane.xlu1 %1053 }
 0x1a8   :  { %1612 = vst [vmem:[#allocation2 + $0x50] sm:$0xff] %v1574_v51  ;;  %v1121_v25 = vadd.f32 %v1054_v9, %v940_v59  ;;  %v513_v43 = vpop.f32.mrf.mxu2 }
 0x1a9   :  { %1688 = vst [vmem:[#allocation2 + $0x58] sm:$0xff] %v1650_v35  ;;  %v1253_v54 = vsub.f32 1.5, %v1252_v1  ;;  %v908_v57 = vmul.f32 %v3246_v39, %v3246_v39  ;;  %v1022_v3 = vmul.f32 %v3254_v44, %v3254_v44  ;;  %v514_v47 = vadd.f32 %v513_v43, %v2985_v48  ;;  %v644_v40 = vpop.f32.mrf.mxu3 }
 0x1aa   :  { %v1848_v23 = vpop.eup %1847  ;;  %v3261_v63 = vmax.f32 %v1121_v25, 1e-24  ;;  %563 = vmatmul.f32.gmra.mxu2 %v1915_v19  ;;  %700 = vmatmul.f32.gmra.mxu3 %v2889_v46  ;;  %v3812_v46 = vld [vmem:[#allocation11_spill] sm:$0xff] }
 0x1ab   :  { %v1254_v7 = vmul.f32 %v1846_v34, %v1253_v54  ;;  %v1260_v52 = vmul.f32 %v1848_v23, %v3227_v27  ;;  %969 = vadd.xlane.f32.xlu2 %v908_v57  ;;  %1083 = vadd.xlane.f32.xlu1 %v1022_v3  ;;  %v645_v4 = vadd.f32 %v644_v40, %v514_v47  ;;  %vm1266_vm5 = vweird.f32 %v1848_v23  ;;  %v1916_v3 = vld [vmem:[%s3756_s0 + $0x1a0] sm:$0xff] }
 0x1ac   :  { %1849 = vrsqrt.f32 %v3261_v63  ;;  %vm1267_vm7 = vmor %vm1265_vm6, %vm1266_vm5  ;;  %vm1275_vm9 = vweird.f32 %v3261_v63 }
 0x1ad   :  { %v1258_v15 = vsel %vm1257_vm4, %v1846_v34, %v1254_v7  ;;  %v1261_v38 = vmul.f32 %v1848_v23, %v1260_v52  ;;  %1729 = vst [vmem:[%s3763_s7 + $0x40] sm:$0xff] %v645_v4  ;;  %v303_v7 = vadd.f32 %v2856_v62, %v2611_v16 }
 0x1ae   :  { %v1575_v11 = vmul.f32 %v1258_v15, %v2764_v60  ;;  %v1651_v56 = vmul.f32 %v1258_v15, %v3810_v8  ;;  %v430_v58 = vpop.f32.mrf.mxu1  ;;  %v843_v55 = vpop.f32.mrf.mxu0 }
 0x1af   :  { %v1262_v51 = vmul.f32 0.5, %v1261_v38  ;;  %v3278_v35 = vadd.f32 %v430_v58, %v300_v26  ;;  %v3281_v61 = vadd.f32 %v3251_v12, %v843_v55  ;;  %v1056_v17 = vpop.xlane.xlu2 %1055  ;;  %v942_v22 = vpop.xlane.xlu0 %941 }
 0x1b0   :  { %1613 = vst [vmem:[#allocation2 + $0x60] sm:$0xff] %v1575_v11  ;;  %v1122_v34 = vadd.f32 %v1056_v17, %v942_v22  ;;  %v516_v1 = vpop.f32.mrf.mxu2 }
 0x1b1   :  { %1689 = vst [vmem:[#allocation2 + $0x68] sm:$0xff] %v1651_v56  ;;  %v1263_v59 = vsub.f32 1.5, %v1262_v51  ;;  %v1023_v60 = vmul.f32 %v3281_v61, %v3281_v61  ;;  %v909_v9 = vmul.f32 %v3278_v35, %v3278_v35  ;;  %v517_v25 = vadd.f32 %v516_v1, %v2985_v48  ;;  %v647_v43 = vpop.f32.mrf.mxu3 }
 0x1b2   :  { %v1850_v54 = vpop.eup %1849  ;;  %v3288_v57 = vmax.f32 %v1122_v34, 1e-24  ;;  %566 = vmatmul.f32.gmra.mxu2 %v1916_v3  ;;  %v306_v3 = vadd.f32 %v2882_v0, %v2611_v16  ;;  %703 = vmatmul.f32.gmra.mxu3 %v2913_v37 }
 0x1b3   :  { %v1264_v47 = vmul.f32 %v1848_v23, %v1263_v59  ;;  %v1270_v40 = vmul.f32 %v1850_v54, %v3261_v63  ;;  %1085 = vadd.xlane.f32.xlu2 %v1023_v60  ;;  %971 = vadd.xlane.f32.xlu0 %v909_v9  ;;  %v648_v19 = vadd.f32 %v647_v43, %v517_v25  ;;  %vm1276_vm8 = vweird.f32 %v1850_v54  ;;  %v1917_v60 = vld [vmem:[%s3756_s0 + $0x1b0] sm:$0xff] }
 0x1b4   :  { %1851 = vrsqrt.f32 %v3288_v57  ;;  %vm1277_vm10 = vmor %vm1275_vm9, %vm1276_vm8  ;;  %vm1285_vm12 = vweird.f32 %v3288_v57 }
 0x1b5   :  { %v1268_v52 = vsel %vm1267_vm7, %v1848_v23, %v1264_v47  ;;  %v1271_v4 = vmul.f32 %v1850_v54, %v1270_v40  ;;  %1730 = vst [vmem:[%s3763_s7 + $0x48] sm:$0xff] %v648_v19 }
 0x1b6   :  { %v1576_v27 = vmul.f32 %v1268_v52, %v3811_v5  ;;  %v1652_v26 = vmul.f32 %v1268_v52, %v2793_v13  ;;  %v433_v15 = vpop.f32.mrf.mxu1  ;;  %v846_v38 = vpop.f32.mrf.mxu0 }
 0x1b7   :  { %v1272_v11 = vmul.f32 0.5, %v1271_v4  ;;  %v3305_v8 = vadd.f32 %v433_v15, %v303_v7  ;;  %v3308_v56 = vadd.f32 %v3251_v12, %v846_v38  ;;  %v944_v58 = vpop.xlane.xlu1 %943  ;;  %v1058_v62 = vpop.xlane.xlu0 %1057 }
 0x1b8   :  { %1614 = vst [vmem:[#allocation2 + $0x70] sm:$0xff] %v1576_v27  ;;  %v1123_v23 = vadd.f32 %v1058_v62, %v944_v58  ;;  %v519_v55 = vpop.f32.mrf.mxu2 }
 0x1b9   :  { %1690 = vst [vmem:[#allocation2 + $0x78] sm:$0xff] %v1652_v26  ;;  %v1273_v51 = vsub.f32 1.5, %v1272_v11  ;;  %v910_v17 = vmul.f32 %v3305_v8, %v3305_v8  ;;  %v1024_v13 = vmul.f32 %v3308_v56, %v3308_v56  ;;  %v520_v22 = vadd.f32 %v519_v55, %v2985_v48  ;;  %v650_v34 = vpop.f32.mrf.mxu3 }
 0x1ba   :  { %v1852_v1 = vpop.eup %1851  ;;  %v3315_v59 = vmax.f32 %v1123_v23, 1e-24  ;;  %569 = vmatmul.f32.gmra.mxu2 %v1917_v60  ;;  %706 = vmatmul.f32.gmra.mxu3 %v2939_v45  ;;  %v3814_v45 = vld [vmem:[#allocation15_spill] sm:$0xff] }
 0x1bb   :  { %v1274_v9 = vmul.f32 %v1850_v54, %v1273_v51  ;;  %v1280_v25 = vmul.f32 %v1852_v1, %v3288_v57  ;;  %973 = vadd.xlane.f32.xlu1 %v910_v17  ;;  %1087 = vadd.xlane.f32.xlu0 %v1024_v13  ;;  %v651_v43 = vadd.f32 %v650_v34, %v520_v22  ;;  %vm1286_vm11 = vweird.f32 %v1852_v1  ;;  %v1918_v51 = vld [vmem:[%s3756_s0 + $0x1c0] sm:$0xff] }
 0x1bc   :  { %1853 = vrsqrt.f32 %v3315_v59  ;;  %vm1287_vm13 = vmor %vm1285_vm12, %vm1286_vm11  ;;  %v309_v34 = vadd.f32 %v2908_v2, %v2611_v16  ;;  %v3813_v57 = vld [vmem:[#allocation13_spill] sm:$0xff]  ;;  %vm1295_vm15 = vweird.f32 %v3315_v59 }
 0x1bd   :  { %v1278_v47 = vsel %vm1277_vm10, %v1850_v54, %v1274_v9  ;;  %v1281_v40 = vmul.f32 %v1852_v1, %v1280_v25  ;;  %1731 = vst [vmem:[%s3763_s7 + $0x50] sm:$0xff] %v651_v43 }
 0x1be   :  { %v1577_v63 = vmul.f32 %v1278_v47, %v3812_v46  ;;  %v1653_v19 = vmul.f32 %v1278_v47, %v2819_v33  ;;  %v436_v7 = vpop.f32.mrf.mxu1  ;;  %v849_v52 = vpop.f32.mrf.mxu0 }
 0x1bf   :  { %v1282_v4 = vmul.f32 0.5, %v1281_v40  ;;  %v3332_v5 = vadd.f32 %v436_v7, %v306_v3  ;;  %v3335_v27 = vadd.f32 %v3251_v12, %v849_v52  ;;  %v946_v26 = vpop.xlane.xlu2 %945  ;;  %v1060_v0 = vpop.xlane.xlu1 %1059 }
 0x1c0   :  { %1615 = vst [vmem:[#allocation2 + $0x80] sm:$0xff] %v1577_v63  ;;  %v1124_v54 = vadd.f32 %v1060_v0, %v946_v26  ;;  %v522_v15 = vpop.f32.mrf.mxu2 }
 0x1c1   :  { %1691 = vst [vmem:[#allocation2 + $0x88] sm:$0xff] %v1653_v19  ;;  %v1283_v38 = vsub.f32 1.5, %v1282_v4  ;;  %v911_v11 = vmul.f32 %v3332_v5, %v3332_v5  ;;  %v1025_v33 = vmul.f32 %v3335_v27, %v3335_v27  ;;  %v523_v58 = vadd.f32 %v522_v15, %v2985_v48  ;;  %v653_v62 = vpop.f32.mrf.mxu3  ;;  %v1919_v15 = vld [vmem:[%s3756_s0 + $0x1d0] sm:$0xff] }
 0x1c2   :  { %v1854_v23 = vpop.eup %1853  ;;  %v3342_v55 = vmax.f32 %v1124_v54, 1e-24  ;;  %572 = vmatmul.f32.gmra.mxu2 %v1918_v51  ;;  %709 = vmatmul.f32.gmra.mxu3 %v2965_v50  ;;  %v3816_v50 = vld [vmem:[#allocation17_spill] sm:$0xff] }
 0x1c3   :  { %v1284_v17 = vmul.f32 %v1852_v1, %v1283_v38  ;;  %v1290_v13 = vmul.f32 %v1854_v23, %v3315_v59  ;;  %975 = vadd.xlane.f32.xlu2 %v911_v11  ;;  %1089 = vadd.xlane.f32.xlu1 %v1025_v33  ;;  %v654_v22 = vadd.f32 %v653_v62, %v523_v58  ;;  %vm1296_vm14 = vweird.f32 %v1854_v23 }
 0x1c4   :  { %1855 = vrsqrt.f32 %v3342_v55  ;;  %vm1297_vm0 = vmor %vm1295_vm15, %vm1296_vm14  ;;  %v312_v58 = vadd.f32 %v2934_v28, %v2611_v16  ;;  %vm1305_vm2 = vweird.f32 %v3342_v55 }
 0x1c5   :  { %v1288_v60 = vsel %vm1287_vm13, %v1852_v1, %v1284_v17  ;;  %v1291_v9 = vmul.f32 %v1854_v23, %v1290_v13  ;;  %1732 = vst [vmem:[%s3763_s7 + $0x58] sm:$0xff] %v654_v22 }
 0x1c6   :  { %v1578_v37 = vmul.f32 %v1288_v60, %v2842_v30  ;;  %v1654_v25 = vmul.f32 %v1288_v60, %v3813_v57  ;;  %v439_v43 = vpop.f32.mrf.mxu1  ;;  %v852_v3 = vpop.f32.mrf.mxu0 }
 0x1c7   :  { %v1292_v47 = vmul.f32 0.5, %v1291_v9  ;;  %v3359_v40 = vadd.f32 %v439_v43, %v309_v34  ;;  %v3362_v46 = vadd.f32 %v3251_v12, %v852_v3  ;;  %v1062_v63 = vpop.xlane.xlu2 %1061  ;;  %v948_v2 = vpop.xlane.xlu0 %947 }
 0x1c8   :  { %1616 = vst [vmem:[#allocation2 + $0x90] sm:$0xff] %v1578_v37  ;;  %v1125_v1 = vadd.f32 %v1062_v63, %v948_v2  ;;  %v525_v19 = vpop.f32.mrf.mxu2 }
 0x1c9   :  { %1692 = vst [vmem:[#allocation2 + $0x98] sm:$0xff] %v1654_v25  ;;  %v1293_v7 = vsub.f32 1.5, %v1292_v47  ;;  %v1026_v30 = vmul.f32 %v3362_v46, %v3362_v46  ;;  %v912_v52 = vmul.f32 %v3359_v40, %v3359_v40  ;;  %v526_v4 = vadd.f32 %v525_v19, %v2985_v48  ;;  %v656_v26 = vpop.f32.mrf.mxu3 }
 0x1ca   :  { %v1856_v0 = vpop.eup %1855  ;;  %v3369_v54 = vmax.f32 %v1125_v1, 1e-24  ;;  %575 = vmatmul.f32.gmra.mxu2 %v1919_v15  ;;  %v1920_v1 = vld [vmem:[%s3756_s0 + $0x1e0] sm:$0xff]  ;;  %712 = vmatmul.f32.gmra.mxu3 %v2992_v20  ;;  %v3819_v20 = vld [vmem:[#allocation19_spill] sm:$0xff] }
 0x1cb   :  { %v1294_v38 = vmul.f32 %v1854_v23, %v1293_v7  ;;  %v1300_v11 = vmul.f32 %v1856_v0, %v3342_v55  ;;  %1091 = vadd.xlane.f32.xlu2 %v1026_v30  ;;  %977 = vadd.xlane.f32.xlu0 %v912_v52  ;;  %v657_v33 = vadd.f32 %v656_v26, %v526_v4  ;;  %vm1306_vm1 = vweird.f32 %v1856_v0  ;;  %v3815_v52 = vld [vmem:[#allocation25_spill] sm:$0xff] }
 0x1cc   :  { %1857 = vrsqrt.f32 %v3369_v54  ;;  %vm1307_vm3 = vmor %vm1305_vm2, %vm1306_vm1  ;;  %v315_v4 = vadd.f32 %v3815_v52, %v2611_v16  ;;  %vm1315_vm5 = vweird.f32 %v3369_v54  ;;  %v3820_v52 = vld [vmem:[#allocation20_spill] sm:$0xff] }
 0x1cd   :  { %v1298_v62 = vsel %vm1297_vm0, %v1854_v23, %v1294_v38  ;;  %v1301_v51 = vmul.f32 %v1856_v0, %v1300_v11  ;;  %1733 = vst [vmem:[%s3763_s7 + $0x60] sm:$0xff] %v657_v33  ;;  %v3817_v38 = vld [vmem:[#allocation18_spill] sm:$0xff] }
 0x1ce   :  { %v1579_v59 = vmul.f32 %v1298_v62, %v3814_v45  ;;  %v1655_v17 = vmul.f32 %v1298_v62, %v2871_v31  ;;  %v442_v13 = vpop.f32.mrf.mxu1  ;;  %v855_v22 = vpop.f32.mrf.mxu0 }
 0x1cf   :  { %v1302_v34 = vmul.f32 0.5, %v1301_v51  ;;  %v3386_v60 = vadd.f32 %v442_v13, %v312_v58  ;;  %v3389_v9 = vadd.f32 %v3251_v12, %v855_v22  ;;  %v950_v37 = vpop.xlane.xlu1 %949  ;;  %v1064_v28 = vpop.xlane.xlu0 %1063 }
 0x1d0   :  { %1617 = vst [vmem:[#allocation2 + $0xa0] sm:$0xff] %v1579_v59  ;;  %v1126_v23 = vadd.f32 %v1064_v28, %v950_v37  ;;  %v528_v57 = vpop.f32.mrf.mxu2 }
 0x1d1   :  { %1693 = vst [vmem:[#allocation2 + $0xa8] sm:$0xff] %v1655_v17  ;;  %v1303_v25 = vsub.f32 1.5, %v1302_v34  ;;  %v913_v43 = vmul.f32 %v3386_v60, %v3386_v60  ;;  %v1027_v31 = vmul.f32 %v3389_v9, %v3389_v9  ;;  %v529_v3 = vadd.f32 %v528_v57, %v2985_v48  ;;  %v659_v47 = vpop.f32.mrf.mxu3 }
 0x1d2   :  { %v1858_v63 = vpop.eup %1857  ;;  %v3396_v2 = vmax.f32 %v1126_v23, 1e-24  ;;  %578 = vmatmul.f32.gmra.mxu2 %v1920_v1  ;;  %v3818_v1 = vld [vmem:[#allocation8_spill] sm:$0xff] }
 0x1d3   :  { %v1304_v19 = vmul.f32 %v1856_v0, %v1303_v25  ;;  %v1310_v7 = vmul.f32 %v1858_v63, %v3369_v54  ;;  %979 = vadd.xlane.f32.xlu1 %v913_v43  ;;  %1093 = vadd.xlane.f32.xlu0 %v1027_v31  ;;  %v660_v30 = vadd.f32 %v659_v47, %v529_v3  ;;  %vm1316_vm4 = vweird.f32 %v1858_v63  ;;  %v1921_v43 = vld [vmem:[%s3756_s0 + $0x1f0] sm:$0xff] }
 0x1d4   :  { %1859 = vrsqrt.f32 %v3396_v2  ;;  %vm1317_vm6 = vmor %vm1315_vm5, %vm1316_vm4  ;;  %vm1325_vm8 = vweird.f32 %v3396_v2 }
 0x1d5   :  { %v1308_v26 = vsel %vm1307_vm3, %v1856_v0, %v1304_v19  ;;  %v1311_v15 = vmul.f32 %v1858_v63, %v1310_v7  ;;  %1734 = vst [vmem:[%s3763_s7 + $0x68] sm:$0xff] %v660_v30  ;;  %v318_v19 = vadd.f32 %v3818_v1, %v2611_v16 }
 0x1d6   :  { %v1580_v55 = vmul.f32 %v1308_v26, %v3816_v50  ;;  %v1656_v11 = vmul.f32 %v1308_v26, %v3817_v38  ;;  %v445_v33 = vpop.f32.mrf.mxu1  ;;  %v858_v58 = vpop.f32.mrf.mxu0 }
 0x1d7   :  { %v1312_v62 = vmul.f32 0.5, %v1311_v15  ;;  %v3413_v51 = vadd.f32 %v445_v33, %v315_v4  ;;  %v3416_v45 = vadd.f32 %v3251_v12, %v858_v58  ;;  %v952_v59 = vpop.xlane.xlu2 %951  ;;  %v1066_v17 = vpop.xlane.xlu1 %1065 }
 0x1d8   :  { %1618 = vst [vmem:[#allocation2 + $0xb0] sm:$0xff] %v1580_v55  ;;  %v1127_v0 = vadd.f32 %v1066_v17, %v952_v59  ;;  %v531_v13 = vpop.f32.mrf.mxu2 }
 0x1d9   :  { %1694 = vst [vmem:[#allocation2 + $0xb8] sm:$0xff] %v1656_v11  ;;  %v1313_v22 = vsub.f32 1.5, %v1312_v62  ;;  %v914_v34 = vmul.f32 %v3413_v51, %v3413_v51  ;;  %v1028_v37 = vmul.f32 %v3416_v45, %v3416_v45  ;;  %v532_v28 = vadd.f32 %v531_v13, %v2985_v48  ;;  %v662_v23 = vpop.f32.mrf.mxu3 }
 0x1da   :  { %v1860_v57 = vpop.eup %1859  ;;  %v3423_v25 = vmax.f32 %v1127_v0, 1e-24  ;;  %581 = vmatmul.f32.gmra.mxu2 %v1921_v43 }
 0x1db   :  { %v1314_v31 = vmul.f32 %v1858_v63, %v1313_v22  ;;  %v1320_v3 = vmul.f32 %v1860_v57, %v3396_v2  ;;  %981 = vadd.xlane.f32.xlu2 %v914_v34  ;;  %1095 = vadd.xlane.f32.xlu1 %v1028_v37  ;;  %v663_v47 = vadd.f32 %v662_v23, %v532_v28  ;;  %vm1326_vm7 = vweird.f32 %v1860_v57  ;;  %v1922_v37 = vld [vmem:[%s3756_s0 + $0x200] sm:$0xff]  ;;  %v1923_v28 = vld [vmem:[%s3756_s0 + $0x208] sm:$0xff] }
 0x1dc   :  { %1861 = vrsqrt.f32 %v3423_v25  ;;  %715 = vmatmul.f32.gmra.mxu3 %v1923_v28  ;;  %vm1327_vm9 = vmor %vm1325_vm8, %vm1326_vm7  ;;  %v1925_v28 = vld [vmem:[%s3756_s0 + $0x218] sm:$0xff]  ;;  %vm1335_vm11 = vweird.f32 %v3423_v25 }
 0x1dd   :  { %v1318_v7 = vsel %vm1317_vm6, %v1858_v63, %v1314_v31  ;;  %v1321_v30 = vmul.f32 %v1860_v57, %v1320_v3  ;;  %1735 = vst [vmem:[%s3763_s7 + $0x70] sm:$0xff] %v663_v47  ;;  %v3821_v3 = vld [vmem:[#allocation10_spill] sm:$0xff] }
 0x1de   :  { %v1581_v54 = vmul.f32 %v1318_v7, %v3819_v20  ;;  %v1657_v4 = vmul.f32 %v1318_v7, %v3820_v52  ;;  %v448_v26 = vpop.f32.mrf.mxu1  ;;  %v861_v15 = vpop.f32.mrf.mxu0  ;;  %v321_v47 = vadd.f32 %v3821_v3, %v2611_v16  ;;  %v3822_v7 = vld [vmem:[#allocation22_spill] sm:$0xff]  ;;  %v3824_v3 = vld [vmem:[#allocation12_spill] sm:$0xff] }
 0x1df   :  { %v1322_v50 = vmul.f32 0.5, %v1321_v30  ;;  %v3440_v55 = vadd.f32 %v448_v26, %v318_v19  ;;  %v3443_v38 = vadd.f32 %v3251_v12, %v861_v15  ;;  %v1068_v11 = vpop.xlane.xlu2 %1067  ;;  %v954_v33 = vpop.xlane.xlu0 %953  ;;  %v3823_v30 = vld [vmem:[#allocation23_spill] sm:$0xff] }
 0x1e0   :  { %1619 = vst [vmem:[#allocation2 + $0xc0] sm:$0xff] %v1581_v54  ;;  %v1128_v63 = vadd.f32 %v1068_v11, %v954_v33  ;;  %v534_v58 = vpop.f32.mrf.mxu2 }
 0x1e1   :  { %1695 = vst [vmem:[#allocation2 + $0xc8] sm:$0xff] %v1657_v4  ;;  %v1323_v62 = vsub.f32 1.5, %v1322_v50  ;;  %v1029_v59 = vmul.f32 %v3443_v38, %v3443_v38  ;;  %v915_v17 = vmul.f32 %v3440_v55, %v3440_v55  ;;  %v535_v0 = vadd.f32 %v534_v58, %v2985_v48  ;;  %v665_v13 = vpop.f32.mrf.mxu3 }
 0x1e2   :  { %v1862_v22 = vpop.eup %1861  ;;  %v3450_v34 = vmax.f32 %v1128_v63, 1e-24  ;;  %584 = vmatmul.f32.gmra.mxu2 %v1922_v37  ;;  %v1924_v37 = vld [vmem:[%s3756_s0 + $0x210] sm:$0xff] }
 0x1e3   :  { %v1324_v23 = vmul.f32 %v1860_v57, %v1323_v62  ;;  %v1330_v43 = vmul.f32 %v1862_v22, %v3423_v25  ;;  %1097 = vadd.xlane.f32.xlu2 %v1029_v59  ;;  %983 = vadd.xlane.f32.xlu0 %v915_v17  ;;  %v666_v31 = vadd.f32 %v665_v13, %v535_v0  ;;  %vm1336_vm10 = vweird.f32 %v1862_v22 }
 0x1e4   :  { %1863 = vrsqrt.f32 %v3450_v34  ;;  %718 = vmatmul.f32.gmra.mxu3 %v1925_v28  ;;  %vm1337_vm12 = vmor %vm1335_vm11, %vm1336_vm10  ;;  %vm1345_vm14 = vweird.f32 %v3450_v34 }
 0x1e5   :  { %v1328_v1 = vsel %vm1327_vm9, %v1860_v57, %v1324_v23  ;;  %v1331_v19 = vmul.f32 %v1862_v22, %v1330_v43  ;;  %1736 = vst [vmem:[%s3763_s7 + $0x78] sm:$0xff] %v666_v31 }
 0x1e6   :  { %v1582_v2 = vmul.f32 %v1328_v1, %v3822_v7  ;;  %v1658_v20 = vmul.f32 %v1328_v1, %v3823_v30  ;;  %v451_v54 = vpop.f32.mrf.mxu1  ;;  %v864_v52 = vpop.f32.mrf.mxu0  ;;  %v3825_v7 = vld [vmem:[#allocation26_spill] sm:$0xff] }
 0x1e7   :  { %v1332_v4 = vmul.f32 0.5, %v1331_v19  ;;  %v3469_v26 = vadd.f32 %v451_v54, %v321_v47  ;;  %v3472_v15 = vadd.f32 %v3251_v12, %v864_v52  ;;  %v956_v50 = vpop.xlane.xlu1 %955  ;;  %v1070_v11 = vpop.xlane.xlu0 %1069  ;;  %v324_v47 = vadd.f32 %v3824_v3, %v2611_v16 }
 0x1e8   :  { %1620 = vst [vmem:[#allocation2 + $0xd0] sm:$0xff] %v1582_v2  ;;  %v1129_v57 = vadd.f32 %v1070_v11, %v956_v50  ;;  %v537_v33 = vpop.f32.mrf.mxu2  ;;  %v3826_v2 = vld [vmem:[#allocation27_spill] sm:$0xff] }
 0x1e9   :  { %1696 = vst [vmem:[#allocation2 + $0xd8] sm:$0xff] %v1658_v20  ;;  %v1333_v63 = vsub.f32 1.5, %v1332_v4  ;;  %v916_v58 = vmul.f32 %v3469_v26, %v3469_v26  ;;  %v1030_v62 = vmul.f32 %v3472_v15, %v3472_v15  ;;  %v538_v59 = vadd.f32 %v537_v33, %v2985_v48  ;;  %v668_v17 = vpop.f32.mrf.mxu3 }
 0x1ea   :  { %v1864_v0 = vpop.eup %1863  ;;  %v3479_v13 = vmax.f32 %v1129_v57, 1e-24  ;;  %587 = vmatmul.f32.gmra.mxu2 %v1924_v37 }
 0x1eb   :  { %v1334_v23 = vmul.f32 %v1862_v22, %v1333_v63  ;;  %v1340_v43 = vmul.f32 %v1864_v0, %v3450_v34  ;;  %985 = vadd.xlane.f32.xlu1 %v916_v58  ;;  %1099 = vadd.xlane.f32.xlu0 %v1030_v62  ;;  %v669_v31 = vadd.f32 %v668_v17, %v538_v59  ;;  %vm1346_vm13 = vweird.f32 %v1864_v0 }
 0x1ec   :  { %1865 = vrsqrt.f32 %v3479_v13  ;;  %vm1347_vm15 = vmor %vm1345_vm14, %vm1346_vm13  ;;  %vm1355_vm1 = vweird.f32 %v3479_v13 }
 0x1ed   :  { %v1338_v1 = vsel %vm1337_vm12, %v1862_v22, %v1334_v23  ;;  %v1341_v19 = vmul.f32 %v1864_v0, %v1340_v43  ;;  %1737 = vst [vmem:[%s3763_s7 + $0x80] sm:$0xff] %v669_v31  ;;  %v1926_v23 = vld [vmem:[%s3756_s0 + $0x220] sm:$0xff]  ;;  %v1927_v43 = vld [vmem:[%s3756_s0 + $0x228] sm:$0xff] }
 0x1ee   :  { %v1583_v25 = vmul.f32 %v1338_v1, %v3825_v7  ;;  %v1659_v30 = vmul.f32 %v1338_v1, %v3826_v2  ;;  %v454_v20 = vpop.f32.mrf.mxu1  ;;  %v867_v54 = vpop.f32.mrf.mxu0  ;;  %721 = vmatmul.f32.gmra.mxu3 %v1927_v43  ;;  %v3827_v1 = vld [vmem:[#allocation14_spill] sm:$0xff]  ;;  %v1929_v43 = vld [vmem:[%s3756_s0 + $0x238] sm:$0xff] }
 0x1ef   :  { %v1342_v52 = vmul.f32 0.5, %v1341_v19  ;;  %v3498_v4 = vadd.f32 %v454_v20, %v324_v47  ;;  %v3501_v50 = vadd.f32 %v3251_v12, %v867_v54  ;;  %v958_v11 = vpop.xlane.xlu2 %957  ;;  %v1072_v57 = vpop.xlane.xlu1 %1071  ;;  %v327_v19 = vadd.f32 %v3827_v1, %v2611_v16  ;;  %v3828_v1 = vld [vmem:[#allocation16_spill] sm:$0xff] }
 0x1f0   :  { %1621 = vst [vmem:[#allocation2 + $0xe0] sm:$0xff] %v1583_v25  ;;  %v1130_v22 = vadd.f32 %v1072_v57, %v958_v11  ;;  %v540_v33 = vpop.f32.mrf.mxu2 }
 0x1f1   :  { %1697 = vst [vmem:[#allocation2 + $0xe8] sm:$0xff] %v1659_v30  ;;  %v1343_v63 = vsub.f32 1.5, %v1342_v52  ;;  %v917_v58 = vmul.f32 %v3498_v4, %v3498_v4  ;;  %v1031_v62 = vmul.f32 %v3501_v50, %v3501_v50  ;;  %v541_v59 = vadd.f32 %v540_v33, %v2985_v48  ;;  %v671_v17 = vpop.f32.mrf.mxu3 }
 0x1f2   :  { %v1866_v37 = vpop.eup %1865  ;;  %v3508_v28 = vmax.f32 %v1130_v22, 1e-24  ;;  %590 = vmatmul.f32.gmra.mxu2 %v1926_v23  ;;  %v1928_v23 = vld [vmem:[%s3756_s0 + $0x230] sm:$0xff] }
 0x1f3   :  { %v1344_v31 = vmul.f32 %v1864_v0, %v1343_v63  ;;  %v1350_v3 = vmul.f32 %v1866_v37, %v3479_v13  ;;  %987 = vadd.xlane.f32.xlu2 %v917_v58  ;;  %1101 = vadd.xlane.f32.xlu1 %v1031_v62  ;;  %v672_v47 = vadd.f32 %v671_v17, %v541_v59  ;;  %vm1356_vm0 = vweird.f32 %v1866_v37 }
 0x1f4   :  { %1867 = vrsqrt.f32 %v3508_v28  ;;  %vm1357_vm2 = vmor %vm1355_vm1, %vm1356_vm0  ;;  %vm1365_vm4 = vweird.f32 %v3508_v28 }
 0x1f5   :  { %v1348_v7 = vsel %vm1347_vm15, %v1864_v0, %v1344_v31  ;;  %v1351_v25 = vmul.f32 %v1866_v37, %v1350_v3  ;;  %1738 = vst [vmem:[%s3763_s7 + $0x88] sm:$0xff] %v672_v47 }
 0x1f6   :  { %v1584_v34 = vmul.f32 %v1348_v7, %v2998_v29  ;;  %v1660_v2 = vmul.f32 %v1348_v7, %v3001_v53  ;;  %v457_v30 = vpop.f32.mrf.mxu1  ;;  %v870_v20 = vpop.f32.mrf.mxu0  ;;  %724 = vmatmul.f32.gmra.mxu3 %v1929_v43 }
 0x1f7   :  { %v1352_v54 = vmul.f32 0.5, %v1351_v25  ;;  %v3527_v52 = vadd.f32 %v457_v30, %v327_v19  ;;  %v3530_v11 = vadd.f32 %v3251_v12, %v870_v20  ;;  %v1074_v57 = vpop.xlane.xlu2 %1073  ;;  %v960_v22 = vpop.xlane.xlu0 %959  ;;  %v330_v19 = vadd.f32 %v3828_v1, %v2611_v16  ;;  %v1931_v1 = vld [vmem:[%s3756_s0 + $0x248] sm:$0xff] }
 0x1f8   :  { %1622 = vst [vmem:[#allocation2 + $0xf0] sm:$0xff] %v1584_v34  ;;  %v1131_v0 = vadd.f32 %v1074_v57, %v960_v22  ;;  %v543_v33 = vpop.f32.mrf.mxu2  ;;  %v3829_v34 = vld [vmem:[#allocation29_spill] sm:$0xff] }
 0x1f9   :  { %1698 = vst [vmem:[#allocation2 + $0xf8] sm:$0xff] %v1660_v2  ;;  %v1353_v63 = vsub.f32 1.5, %v1352_v54  ;;  %v1032_v29 = vmul.f32 %v3530_v11, %v3530_v11  ;;  %v918_v53 = vmul.f32 %v3527_v52, %v3527_v52  ;;  %v544_v58 = vadd.f32 %v543_v33, %v2985_v48  ;;  %v674_v62 = vpop.f32.mrf.mxu3  ;;  %v3830_v2 = vld [vmem:[#allocation30_spill] sm:$0xff] }
 0x1fa   :  { %v1868_v59 = vpop.eup %1867  ;;  %v3537_v17 = vmax.f32 %v1131_v0, 1e-24  ;;  %593 = vmatmul.f32.gmra.mxu2 %v1928_v23 }
 0x1fb   :  { %v1354_v31 = vmul.f32 %v1866_v37, %v1353_v63  ;;  %v1360_v3 = vmul.f32 %v1868_v59, %v3508_v28  ;;  %1103 = vadd.xlane.f32.xlu2 %v1032_v29  ;;  %989 = vadd.xlane.f32.xlu0 %v918_v53  ;;  %v675_v47 = vadd.f32 %v674_v62, %v544_v58  ;;  %vm1366_vm3 = vweird.f32 %v1868_v59 }
 0x1fc   :  { %1869 = vrsqrt.f32 %v3537_v17  ;;  %vm1367_vm5 = vmor %vm1365_vm4, %vm1366_vm3  ;;  %vm1375_vm7 = vweird.f32 %v3537_v17 }
 0x1fd   :  { %v1358_v7 = vsel %vm1357_vm2, %v1866_v37, %v1354_v31  ;;  %v1361_v25 = vmul.f32 %v1868_v59, %v1360_v3  ;;  %1739 = vst [vmem:[%s3763_s7 + $0x90] sm:$0xff] %v675_v47  ;;  %v1930_v47 = vld [vmem:[%s3756_s0 + $0x240] sm:$0xff] }
 0x1fe   :  { %v1585_v13 = vmul.f32 %v1358_v7, %v3829_v34  ;;  %v1661_v30 = vmul.f32 %v1358_v7, %v3830_v2  ;;  %v460_v20 = vpop.f32.mrf.mxu1  ;;  %v873_v54 = vpop.f32.mrf.mxu0  ;;  %727 = vmatmul.f32.gmra.mxu3 %v1931_v1  ;;  %v3831_v34 = vld [vmem:[#allocation21_spill] sm:$0xff]  ;;  %v1933_v1 = vld [vmem:[%s3756_s0 + $0x258] sm:$0xff] }
 0x1ff   :  { %v1362_v57 = vmul.f32 0.5, %v1361_v25  ;;  %v3556_v22 = vadd.f32 %v460_v20, %v330_v19  ;;  %v3559_v0 = vadd.f32 %v3251_v12, %v873_v54  ;;  %v962_v33 = vpop.xlane.xlu1 %961  ;;  %v1076_v63 = vpop.xlane.xlu0 %1075 }
 0x200   :  { %1623 = vst [vmem:[#allocation2 + $0x100] sm:$0xff] %v1585_v13  ;;  %v1132_v37 = vadd.f32 %v1076_v63, %v962_v33  ;;  %v546_v29 = vpop.f32.mrf.mxu2  ;;  %v333_v13 = vadd.f32 %v3831_v34, %v2611_v16  ;;  %v3832_v34 = vld [vmem:[#allocation24_spill] sm:$0xff] }
 0x201   :  { %1699 = vst [vmem:[#allocation2 + $0x108] sm:$0xff] %v1661_v30  ;;  %v1363_v53 = vsub.f32 1.5, %v1362_v57  ;;  %v919_v58 = vmul.f32 %v3556_v22, %v3556_v22  ;;  %v1033_v62 = vmul.f32 %v3559_v0, %v3559_v0  ;;  %v547_v23 = vadd.f32 %v546_v29, %v2985_v48  ;;  %v677_v43 = vpop.f32.mrf.mxu3 }
 0x202   :  { %v1870_v31 = vpop.eup %1869  ;;  %v3566_v3 = vmax.f32 %v1132_v37, 1e-24  ;;  %596 = vmatmul.f32.gmra.mxu2 %v1930_v47  ;;  %v1932_v47 = vld [vmem:[%s3756_s0 + $0x250] sm:$0xff] }
 0x203   :  { %v1364_v19 = vmul.f32 %v1868_v59, %v1363_v53  ;;  %v1370_v7 = vmul.f32 %v1870_v31, %v3537_v17  ;;  %991 = vadd.xlane.f32.xlu1 %v919_v58  ;;  %1105 = vadd.xlane.f32.xlu0 %v1033_v62  ;;  %v678_v25 = vadd.f32 %v677_v43, %v547_v23  ;;  %vm1376_vm6 = vweird.f32 %v1870_v31  ;;  %v3833_v17 = vld [vmem:[#allocation31_spill] sm:$0xff] }
 0x204   :  { %1871 = vrsqrt.f32 %v3566_v3  ;;  %vm1377_vm8 = vmor %vm1375_vm7, %vm1376_vm6  ;;  %vm1385_vm10 = vweird.f32 %v3566_v3 }
 0x205   :  { %v1368_v2 = vsel %vm1367_vm5, %v1868_v59, %v1364_v19  ;;  %v1371_v30 = vmul.f32 %v1870_v31, %v1370_v7  ;;  %1740 = vst [vmem:[%s3763_s7 + $0x98] sm:$0xff] %v678_v25 }
 0x206   :  { %v1586_v28 = vmul.f32 %v1368_v2, %v3044_v41  ;;  %v1662_v20 = vmul.f32 %v1368_v2, %v3047_v14  ;;  %v463_v54 = vpop.f32.mrf.mxu1  ;;  %v3585_v57 = vpop.f32.mrf.mxu0  ;;  %730 = vmatmul.f32.gmra.mxu3 %v1933_v1 }
 0x207   :  { %v1372_v33 = vmul.f32 0.5, %v1371_v30  ;;  %v3587_v63 = vadd.f32 %v463_v54, %v333_v13  ;;  %v964_v37 = vpop.xlane.xlu2 %963  ;;  %v1078_v29 = vpop.xlane.xlu1 %1077  ;;  %v336_v13 = vadd.f32 %v3832_v34, %v2611_v16 }
 0x208   :  { %1624 = vst [vmem:[#allocation2 + $0x110] sm:$0xff] %v1586_v28  ;;  %v1133_v53 = vadd.f32 %v1078_v29, %v964_v37  ;;  %v549_v59 = vpop.f32.mrf.mxu2 }
 0x209   :  { %1700 = vst [vmem:[#allocation2 + $0x118] sm:$0xff] %v1662_v20  ;;  %v1373_v58 = vsub.f32 1.5, %v1372_v33  ;;  %v920_v62 = vmul.f32 %v3587_v63, %v3587_v63  ;;  %v550_v41 = vadd.f32 %v549_v59, %v2985_v48  ;;  %v680_v14 = vpop.f32.mrf.mxu3 }
 0x20a   :  { %v1872_v23 = vpop.eup %1871  ;;  %v3592_v43 = vmax.f32 %v1133_v53, 1e-24  ;;  %599 = vmatmul.f32.gmra.mxu2 %v1932_v47 }
 0x20b   :  { %v1374_v19 = vmul.f32 %v1870_v31, %v1373_v58  ;;  %v1380_v7 = vmul.f32 %v1872_v23, %v3566_v3  ;;  %993 = vadd.xlane.f32.xlu2 %v920_v62  ;;  %v681_v25 = vadd.f32 %v680_v14, %v550_v41  ;;  %vm1386_vm9 = vweird.f32 %v1872_v23 }
 0x20c   :  { %1873 = vrsqrt.f32 %v3592_v43  ;;  %vm1387_vm11 = vmor %vm1385_vm10, %vm1386_vm9  ;;  %vm1395_vm13 = vweird.f32 %v3592_v43 }
 0x20d   :  { %v1378_v2 = vsel %vm1377_vm8, %v1870_v31, %v1374_v19  ;;  %v1381_v30 = vmul.f32 %v1872_v23, %v1380_v7  ;;  %1741 = vst [vmem:[%s3763_s7 + $0xa0] sm:$0xff] %v681_v25 }
 0x20e   :  { %v1587_v28 = vmul.f32 %v1378_v2, %v3073_v18  ;;  %v1663_v20 = vmul.f32 %v1378_v2, %v3833_v17  ;;  %v466_v54 = vpop.f32.mrf.mxu1  ;;  %v879_v33 = vpop.f32.mrf.mxu0  ;;  %v3834_v2 = vld [vmem:[#allocation28_spill] sm:$0xff] }
 0x20f   :  { %v1382_v37 = vmul.f32 0.5, %v1381_v30  ;;  %v3611_v29 = vadd.f32 %v466_v54, %v336_v13  ;;  %v3614_v53 = vadd.f32 %v3251_v12, %v879_v33  ;;  %v1080_v59 = vpop.xlane.xlu2 %1079  ;;  %v966_v58 = vpop.xlane.xlu0 %965  ;;  %v339_v30 = vadd.f32 %v3834_v2, %v2611_v16 }
 0x210   :  { %1625 = vst [vmem:[#allocation2 + $0x120] sm:$0xff] %v1587_v28  ;;  %v1134_v31 = vadd.f32 %v1080_v59, %v966_v58  ;;  %v552_v62 = vpop.f32.mrf.mxu2  ;;  %v3649_v2 = vadd.f32 %v3251_v12, %v3585_v57 }
 0x211   :  { %1701 = vst [vmem:[#allocation2 + $0x128] sm:$0xff] %v1663_v20  ;;  %v1383_v41 = vsub.f32 1.5, %v1382_v37  ;;  %v1035_v18 = vmul.f32 %v3614_v53, %v3614_v53  ;;  %v921_v14 = vmul.f32 %v3611_v29, %v3611_v29  ;;  %v553_v47 = vadd.f32 %v552_v62, %v2985_v48  ;;  %v683_v1 = vpop.f32.mrf.mxu3 }
 0x212   :  { %v1874_v19 = vpop.eup %1873  ;;  %v3621_v7 = vmax.f32 %v1134_v31, 1e-24 }
 0x213   :  { %v1384_v25 = vmul.f32 %v1872_v23, %v1383_v41  ;;  %v1390_v34 = vmul.f32 %v1874_v19, %v3592_v43  ;;  %1109 = vadd.xlane.f32.xlu2 %v1035_v18  ;;  %995 = vadd.xlane.f32.xlu0 %v921_v14  ;;  %v684_v13 = vadd.f32 %v683_v1, %v553_v47  ;;  %vm1396_vm12 = vweird.f32 %v1874_v19 }
 0x214   :  { %1875 = vrsqrt.f32 %v3621_v7  ;;  %vm1397_vm14 = vmor %vm1395_vm13, %vm1396_vm12  ;;  %vm1405_vm0 = vweird.f32 %v3621_v7 }
 0x215   :  { %v1388_v28 = vsel %vm1387_vm11, %v1872_v23, %v1384_v25  ;;  %v1391_v17 = vmul.f32 %v1874_v19, %v1390_v34  ;;  %1742 = vst [vmem:[%s3763_s7 + $0xa8] sm:$0xff] %v684_v13 }
 0x216   :  { %v1588_v3 = vmul.f32 %v1388_v28, %v3102_v6  ;;  %v1664_v20 = vmul.f32 %v1388_v28, %v3105_v21  ;;  %v469_v54 = vpop.f32.mrf.mxu1  ;;  %v882_v33 = vpop.f32.mrf.mxu0 }
 0x217   :  { %v1392_v37 = vmul.f32 0.5, %v1391_v17  ;;  %v3634_v59 = vadd.f32 %v469_v54, %v339_v30  ;;  %v3637_v58 = vadd.f32 %v3251_v12, %v882_v33  ;;  %v968_v31 = vpop.xlane.xlu1 %967  ;;  %v1082_v16 = vpop.xlane.xlu0 %1081  ;;  %v1034_v12 = vmul.f32 %v3649_v2, %v3649_v2 }
 0x218   :  { %1626 = vst [vmem:[#allocation2 + $0x130] sm:$0xff] %v1588_v3  ;;  %v1135_v23 = vadd.f32 %v1082_v16, %v968_v31  ;;  %v555_v62 = vpop.f32.mrf.mxu2 }
 0x219   :  { %1702 = vst [vmem:[#allocation2 + $0x138] sm:$0xff] %v1664_v20  ;;  %v1393_v41 = vsub.f32 1.5, %v1392_v37  ;;  %v922_v6 = vmul.f32 %v3634_v59, %v3634_v59  ;;  %v1036_v21 = vmul.f32 %v3637_v58, %v3637_v58  ;;  %v556_v18 = vadd.f32 %v555_v62, %v2985_v48  ;;  %v686_v14 = vpop.f32.mrf.mxu3 }
 0x21a   :  { %v1876_v47 = vpop.eup %1875  ;;  %v1173_v1 = vmax.f32 %v1135_v23, 1e-24 }
 0x21b   :  { %v1394_v25 = vmul.f32 %v1874_v19, %v1393_v41  ;;  %v1400_v34 = vmul.f32 %v1876_v47, %v3621_v7  ;;  %997 = vadd.xlane.f32.xlu1 %v922_v6  ;;  %1111 = vadd.xlane.f32.xlu0 %v1036_v21  ;;  %v687_v13 = vadd.f32 %v686_v14, %v556_v18  ;;  %vm1406_vm15 = vweird.f32 %v1876_v47 }
 0x21c   :  { %1877 = vrsqrt.f32 %v1173_v1  ;;  %vm1407_vm1 = vmor %vm1405_vm0, %vm1406_vm15  ;;  %vm1415_vm3 = vweird.f32 %v1173_v1 }
 0x21d   :  { %v1398_v30 = vsel %vm1397_vm14, %v1874_v19, %v1394_v25  ;;  %v1401_v28 = vmul.f32 %v1876_v47, %v1400_v34  ;;  %1743 = vst [vmem:[%s3763_s7 + $0xb0] sm:$0xff] %v687_v13 }
 0x21e   :  { %v1589_v43 = vmul.f32 %v1398_v30, %v3138_v24  ;;  %v1665_v17 = vmul.f32 %v1398_v30, %v3141_v32  ;;  %v970_v3 = vpop.xlane.xlu2 %969 }
 0x21f   :  { %v1402_v20 = vmul.f32 0.5, %v1401_v28  ;;  %v1084_v54 = vpop.xlane.xlu1 %1083 }
 0x220   :  { %1627 = vst [vmem:[#allocation2 + $0x140] sm:$0xff] %v1589_v43  ;;  %v1136_v33 = vadd.f32 %v1084_v54, %v970_v3  ;;  %v558_v37 = vpop.f32.mrf.mxu2 }
 0x221   :  { %1703 = vst [vmem:[#allocation2 + $0x148] sm:$0xff] %v1665_v17  ;;  %v1403_v31 = vsub.f32 1.5, %v1402_v20  ;;  %v559_v57 = vadd.f32 %v558_v37, %v2985_v48  ;;  %v689_v19 = vpop.f32.mrf.mxu3 }
 0x222   :  { %v1878_v16 = vpop.eup %1877  ;;  %v1174_v23 = vmax.f32 %v1136_v33, 1e-24 }
 0x223   :  { %v1404_v24 = vmul.f32 %v1876_v47, %v1403_v31  ;;  %v1410_v32 = vmul.f32 %v1878_v16, %v1173_v1  ;;  %1107 = vadd.xlane.f32.xlu1 %v1034_v12  ;;  %v690_v62 = vadd.f32 %v689_v19, %v559_v57  ;;  %vm1416_vm2 = vweird.f32 %v1878_v16 }
 0x224   :  { %1879 = vrsqrt.f32 %v1174_v23  ;;  %vm1417_vm4 = vmor %vm1415_vm3, %vm1416_vm2  ;;  %vm1425_vm6 = vweird.f32 %v1174_v23 }
 0x225   :  { %v1408_v41 = vsel %vm1407_vm1, %v1876_v47, %v1404_v24  ;;  %v1411_v6 = vmul.f32 %v1878_v16, %v1410_v32  ;;  %1744 = vst [vmem:[%s3763_s7 + $0xb8] sm:$0xff] %v690_v62 }
 0x226   :  { %v1590_v21 = vmul.f32 %v1408_v41, %v3177_v36  ;;  %v1666_v18 = vmul.f32 %v1408_v41, %v3180_v42  ;;  %v1086_v14 = vpop.xlane.xlu2 %1085  ;;  %v972_v25 = vpop.xlane.xlu0 %971 }
 0x227   :  { %v1412_v34 = vmul.f32 0.5, %v1411_v6  ;;  %v1137_v13 = vadd.f32 %v1086_v14, %v972_v25 }
 0x228   :  { %1628 = vst [vmem:[#allocation2 + $0x150] sm:$0xff] %v1590_v21  ;;  %v561_v7 = vpop.f32.mrf.mxu2 }
 0x229   :  { %1704 = vst [vmem:[#allocation2 + $0x158] sm:$0xff] %v1666_v18  ;;  %v1413_v30 = vsub.f32 1.5, %v1412_v34  ;;  %v1175_v28 = vmax.f32 %v1137_v13, 1e-24  ;;  %v562_v47 = vadd.f32 %v561_v7, %v2985_v48  ;;  %v692_v43 = vpop.f32.mrf.mxu3 }
 0x22a   :  { %v1880_v17 = vpop.eup %1879 }
 0x22b   :  { %v1414_v3 = vmul.f32 %v1878_v16, %v1413_v30  ;;  %v1420_v20 = vmul.f32 %v1880_v17, %v1174_v23  ;;  %1881 = vrsqrt.f32 %v1175_v28  ;;  %v693_v36 = vadd.f32 %v692_v43, %v562_v47 }
 0x22c   :  { %vm1426_vm5 = vweird.f32 %v1880_v17  ;;  %vm1435_vm9 = vweird.f32 %v1175_v28 }
 0x22d   :  { %v1418_v42 = vsel %vm1417_vm4, %v1878_v16, %v1414_v3  ;;  %v1421_v54 = vmul.f32 %v1880_v17, %v1420_v20  ;;  %1745 = vst [vmem:[%s3763_s7 + $0xc0] sm:$0xff] %v693_v36  ;;  %vm1427_vm7 = vmor %vm1425_vm6, %vm1426_vm5 }
 0x22e   :  { %v1591_v33 = vmul.f32 %v1418_v42, %v3219_v10  ;;  %v1667_v37 = vmul.f32 %v1418_v42, %v3222_v49  ;;  %v974_v31 = vpop.xlane.xlu1 %973  ;;  %v1088_v12 = vpop.xlane.xlu0 %1087 }
 0x22f   :  { %v1422_v57 = vmul.f32 0.5, %v1421_v54  ;;  %v1138_v19 = vadd.f32 %v1088_v12, %v974_v31 }
 0x230   :  { %1629 = vst [vmem:[#allocation2 + $0x160] sm:$0xff] %v1591_v33  ;;  %v564_v1 = vpop.f32.mrf.mxu2 }
 0x231   :  { %v1882_v24 = vpop.eup %1881  ;;  %1705 = vst [vmem:[#allocation2 + $0x168] sm:$0xff] %v1667_v37  ;;  %v1423_v32 = vsub.f32 1.5, %v1422_v57  ;;  %v1176_v16 = vmax.f32 %v1138_v19, 1e-24  ;;  %v565_v62 = vadd.f32 %v564_v1, %v2985_v48  ;;  %v695_v10 = vpop.f32.mrf.mxu3 }
 0x232   :  { %v1430_v41 = vmul.f32 %v1882_v24, %v1175_v28  ;;  %vm1436_vm8 = vweird.f32 %v1882_v24 }
 0x233   :  { %v1424_v49 = vmul.f32 %v1880_v17, %v1423_v32  ;;  %1883 = vrsqrt.f32 %v1176_v16  ;;  %v696_v6 = vadd.f32 %v695_v10, %v565_v62  ;;  %vm1437_vm10 = vmor %vm1435_vm9, %vm1436_vm8  ;;  %vm1445_vm12 = vweird.f32 %v1176_v16 }
 0x234   :  { %v1431_v21 = vmul.f32 %v1882_v24, %v1430_v41 }
 0x235   :  { %v1428_v18 = vsel %vm1427_vm7, %v1880_v17, %v1424_v49  ;;  %1746 = vst [vmem:[%s3763_s7 + $0xc8] sm:$0xff] %v696_v6 }
 0x236   :  { %v1592_v14 = vmul.f32 %v1428_v18, %v3246_v39  ;;  %v1668_v25 = vmul.f32 %v1428_v18, %v3254_v44  ;;  %v1432_v34 = vmul.f32 0.5, %v1431_v21  ;;  %v976_v13 = vpop.xlane.xlu2 %975  ;;  %v1090_v7 = vpop.xlane.xlu1 %1089 }
 0x237   :  { %v1139_v30 = vadd.f32 %v1090_v7, %v976_v13 }
 0x238   :  { %1630 = vst [vmem:[#allocation2 + $0x170] sm:$0xff] %v1592_v14  ;;  %v1433_v47 = vsub.f32 1.5, %v1432_v34  ;;  %v567_v23 = vpop.f32.mrf.mxu2 }
 0x239   :  { %v1884_v43 = vpop.eup %1883  ;;  %1706 = vst [vmem:[#allocation2 + $0x178] sm:$0xff] %v1668_v25  ;;  %v1177_v3 = vmax.f32 %v1139_v30, 1e-24  ;;  %v568_v17 = vadd.f32 %v567_v23, %v2985_v48  ;;  %v698_v20 = vpop.f32.mrf.mxu3 }
 0x23a   :  { %v1434_v36 = vmul.f32 %v1882_v24, %v1433_v47  ;;  %v1440_v42 = vmul.f32 %v1884_v43, %v1176_v16  ;;  %vm1446_vm11 = vweird.f32 %v1884_v43 }
 0x23b   :  { %1885 = vrsqrt.f32 %v1177_v3  ;;  %v699_v39 = vadd.f32 %v698_v20, %v568_v17  ;;  %vm1447_vm13 = vmor %vm1445_vm12, %vm1446_vm11  ;;  %vm1455_vm15 = vweird.f32 %v1177_v3 }
 0x23c   :  { %v1438_v44 = vsel %vm1437_vm10, %v1882_v24, %v1434_v36  ;;  %v1441_v54 = vmul.f32 %v1884_v43, %v1440_v42 }
 0x23d   :  { %v1593_v33 = vmul.f32 %v1438_v44, %v3278_v35  ;;  %v1669_v37 = vmul.f32 %v1438_v44, %v3281_v61  ;;  %1747 = vst [vmem:[%s3763_s7 + $0xd0] sm:$0xff] %v699_v39 }
 0x23e   :  { %v1442_v31 = vmul.f32 0.5, %v1441_v54  ;;  %v1092_v12 = vpop.xlane.xlu2 %1091  ;;  %v978_v57 = vpop.xlane.xlu0 %977 }
 0x23f   :  { %1631 = vst [vmem:[#allocation2 + $0x180] sm:$0xff] %v1593_v33  ;;  %v1140_v19 = vadd.f32 %v1092_v12, %v978_v57 }
 0x240   :  { %1707 = vst [vmem:[#allocation2 + $0x188] sm:$0xff] %v1669_v37  ;;  %v1443_v28 = vsub.f32 1.5, %v1442_v31  ;;  %v570_v1 = vpop.f32.mrf.mxu2 }
 0x241   :  { %v1886_v32 = vpop.eup %1885  ;;  %v1178_v24 = vmax.f32 %v1140_v19, 1e-24  ;;  %v571_v62 = vadd.f32 %v570_v1, %v2985_v48  ;;  %v701_v35 = vpop.f32.mrf.mxu3 }
 0x242   :  { %v1444_v10 = vmul.f32 %v1884_v43, %v1443_v28  ;;  %v1450_v61 = vmul.f32 %v1886_v32, %v1177_v3  ;;  %vm1456_vm14 = vweird.f32 %v1886_v32 }
 0x243   :  { %1887 = vrsqrt.f32 %v1178_v24  ;;  %v702_v41 = vadd.f32 %v701_v35, %v571_v62  ;;  %vm1457_vm0 = vmor %vm1455_vm15, %vm1456_vm14  ;;  %vm1465_vm2 = vweird.f32 %v1178_v24 }
 0x244   :  { %v1448_v49 = vsel %vm1447_vm13, %v1884_v43, %v1444_v10  ;;  %v1451_v6 = vmul.f32 %v1886_v32, %v1450_v61 }
 0x245   :  { %v1594_v21 = vmul.f32 %v1448_v49, %v3305_v8  ;;  %v1670_v18 = vmul.f32 %v1448_v49, %v3308_v56  ;;  %1748 = vst [vmem:[%s3763_s7 + $0xd8] sm:$0xff] %v702_v41 }
 0x246   :  { %v1452_v14 = vmul.f32 0.5, %v1451_v6  ;;  %v980_v25 = vpop.xlane.xlu1 %979  ;;  %v1094_v34 = vpop.xlane.xlu0 %1093 }
 0x247   :  { %1632 = vst [vmem:[#allocation2 + $0x190] sm:$0xff] %v1594_v21  ;;  %v1141_v13 = vadd.f32 %v1094_v34, %v980_v25 }
 0x248   :  { %1708 = vst [vmem:[#allocation2 + $0x198] sm:$0xff] %v1670_v18  ;;  %v1453_v16 = vsub.f32 1.5, %v1452_v14  ;;  %v573_v7 = vpop.f32.mrf.mxu2 }
 0x249   :  { %v1888_v30 = vpop.eup %1887  ;;  %v1179_v47 = vmax.f32 %v1141_v13, 1e-24  ;;  %v574_v23 = vadd.f32 %v573_v7, %v2985_v48  ;;  %v704_v8 = vpop.f32.mrf.mxu3 }
 0x24a   :  { %v1454_v43 = vmul.f32 %v1886_v32, %v1453_v16  ;;  %v1460_v56 = vmul.f32 %v1888_v30, %v1178_v24  ;;  %vm1466_vm1 = vweird.f32 %v1888_v30 }
 0x24b   :  { %1889 = vrsqrt.f32 %v1179_v47  ;;  %v705_v17 = vadd.f32 %v704_v8, %v574_v23  ;;  %vm1467_vm3 = vmor %vm1465_vm2, %vm1466_vm1  ;;  %vm1475_vm5 = vweird.f32 %v1179_v47 }
 0x24c   :  { %v1458_v20 = vsel %vm1457_vm0, %v1886_v32, %v1454_v43  ;;  %v1461_v36 = vmul.f32 %v1888_v30, %v1460_v56 }
 0x24d   :  { %v1595_v42 = vmul.f32 %v1458_v20, %v3332_v5  ;;  %v1671_v39 = vmul.f32 %v1458_v20, %v3335_v27  ;;  %1749 = vst [vmem:[%s3763_s7 + $0xe0] sm:$0xff] %v705_v17 }
 0x24e   :  { %v1462_v44 = vmul.f32 0.5, %v1461_v36  ;;  %v982_v54 = vpop.xlane.xlu2 %981  ;;  %v1096_v33 = vpop.xlane.xlu1 %1095 }
 0x24f   :  { %1633 = vst [vmem:[#allocation2 + $0x1a0] sm:$0xff] %v1595_v42  ;;  %v1142_v37 = vadd.f32 %v1096_v33, %v982_v54 }
 0x250   :  { %1709 = vst [vmem:[#allocation2 + $0x1a8] sm:$0xff] %v1671_v39  ;;  %v1463_v3 = vsub.f32 1.5, %v1462_v44  ;;  %v576_v31 = vpop.f32.mrf.mxu2 }
 0x251   :  { %v1890_v12 = vpop.eup %1889  ;;  %v1180_v57 = vmax.f32 %v1142_v37, 1e-24  ;;  %v577_v19 = vadd.f32 %v576_v31, %v2985_v48  ;;  %v707_v5 = vpop.f32.mrf.mxu3 }
 0x252   :  { %v1464_v28 = vmul.f32 %v1888_v30, %v1463_v3  ;;  %v1470_v27 = vmul.f32 %v1890_v12, %v1179_v47  ;;  %vm1476_vm4 = vweird.f32 %v1890_v12 }
 0x253   :  { %1891 = vrsqrt.f32 %v1180_v57  ;;  %v708_v1 = vadd.f32 %v707_v5, %v577_v19  ;;  %vm1477_vm6 = vmor %vm1475_vm5, %vm1476_vm4  ;;  %vm1485_vm8 = vweird.f32 %v1180_v57 }
 0x254   :  { %v1468_v32 = vsel %vm1467_vm3, %v1888_v30, %v1464_v28  ;;  %v1471_v62 = vmul.f32 %v1890_v12, %v1470_v27 }
 0x255   :  { %v1596_v35 = vmul.f32 %v1468_v32, %v3359_v40  ;;  %v1672_v10 = vmul.f32 %v1468_v32, %v3362_v46  ;;  %1750 = vst [vmem:[%s3763_s7 + $0xe8] sm:$0xff] %v708_v1 }
 0x256   :  { %v1472_v61 = vmul.f32 0.5, %v1471_v62  ;;  %v1098_v41 = vpop.xlane.xlu2 %1097  ;;  %v984_v49 = vpop.xlane.xlu0 %983 }
 0x257   :  { %1634 = vst [vmem:[#allocation2 + $0x1b0] sm:$0xff] %v1596_v35  ;;  %v1143_v6 = vadd.f32 %v1098_v41, %v984_v49 }
 0x258   :  { %1710 = vst [vmem:[#allocation2 + $0x1b8] sm:$0xff] %v1672_v10  ;;  %v1473_v24 = vsub.f32 1.5, %v1472_v61  ;;  %v579_v21 = vpop.f32.mrf.mxu2 }
 0x259   :  { %v1892_v18 = vpop.eup %1891  ;;  %v1181_v14 = vmax.f32 %v1143_v6, 1e-24  ;;  %v580_v25 = vadd.f32 %v579_v21, %v2985_v48  ;;  %v710_v40 = vpop.f32.mrf.mxu3 }
 0x25a   :  { %v1474_v34 = vmul.f32 %v1890_v12, %v1473_v24  ;;  %v1480_v46 = vmul.f32 %v1892_v18, %v1180_v57  ;;  %vm1486_vm7 = vweird.f32 %v1892_v18 }
 0x25b   :  { %1893 = vrsqrt.f32 %v1181_v14  ;;  %v711_v13 = vadd.f32 %v710_v40, %v580_v25  ;;  %vm1487_vm9 = vmor %vm1485_vm8, %vm1486_vm7  ;;  %vm1495_vm11 = vweird.f32 %v1181_v14 }
 0x25c   :  { %v1478_v16 = vsel %vm1477_vm6, %v1890_v12, %v1474_v34  ;;  %v1481_v7 = vmul.f32 %v1892_v18, %v1480_v46 }
 0x25d   :  { %v1597_v30 = vmul.f32 %v1478_v16, %v3386_v60  ;;  %v1673_v23 = vmul.f32 %v1478_v16, %v3389_v9  ;;  %1751 = vst [vmem:[%s3763_s7 + $0xf0] sm:$0xff] %v711_v13 }
 0x25e   :  { %v1482_v8 = vmul.f32 0.5, %v1481_v7  ;;  %v986_v43 = vpop.xlane.xlu1 %985  ;;  %v1100_v56 = vpop.xlane.xlu0 %1099 }
 0x25f   :  { %1635 = vst [vmem:[#allocation2 + $0x1c0] sm:$0xff] %v1597_v30  ;;  %v1144_v17 = vadd.f32 %v1100_v56, %v986_v43 }
 0x260   :  { %1711 = vst [vmem:[#allocation2 + $0x1c8] sm:$0xff] %v1673_v23  ;;  %v1483_v47 = vsub.f32 1.5, %v1482_v8  ;;  %v582_v20 = vpop.f32.mrf.mxu2 }
 0x261   :  { %v1894_v36 = vpop.eup %1893  ;;  %v1182_v42 = vmax.f32 %v1144_v17, 1e-24  ;;  %v583_v39 = vadd.f32 %v582_v20, %v2985_v48  ;;  %v713_v60 = vpop.f32.mrf.mxu3 }
 0x262   :  { %v1484_v44 = vmul.f32 %v1892_v18, %v1483_v47  ;;  %v1490_v9 = vmul.f32 %v1894_v36, %v1181_v14  ;;  %vm1496_vm10 = vweird.f32 %v1894_v36 }
 0x263   :  { %1895 = vrsqrt.f32 %v1182_v42  ;;  %v714_v54 = vadd.f32 %v713_v60, %v583_v39  ;;  %vm1497_vm12 = vmor %vm1495_vm11, %vm1496_vm10  ;;  %vm1505_vm14 = vweird.f32 %v1182_v42 }
 0x264   :  { %v1488_v33 = vsel %vm1487_vm9, %v1892_v18, %v1484_v44  ;;  %v1491_v37 = vmul.f32 %v1894_v36, %v1490_v9 }
 0x265   :  { %v1598_v3 = vmul.f32 %v1488_v33, %v3413_v51  ;;  %v1674_v31 = vmul.f32 %v1488_v33, %v3416_v45  ;;  %1752 = vst [vmem:[%s3763_s7 + $0xf8] sm:$0xff] %v714_v54 }
 0x266   :  { %v1492_v12 = vmul.f32 0.5, %v1491_v37  ;;  %v988_v19 = vpop.xlane.xlu2 %987  ;;  %v1102_v5 = vpop.xlane.xlu1 %1101 }
 0x267   :  { %1636 = vst [vmem:[#allocation2 + $0x1d0] sm:$0xff] %v1598_v3  ;;  %v1145_v28 = vadd.f32 %v1102_v5, %v988_v19 }
 0x268   :  { %1712 = vst [vmem:[#allocation2 + $0x1d8] sm:$0xff] %v1674_v31  ;;  %v1493_v57 = vsub.f32 1.5, %v1492_v12  ;;  %v585_v27 = vpop.f32.mrf.mxu2 }
 0x269   :  { %v1896_v1 = vpop.eup %1895  ;;  %v1183_v32 = vmax.f32 %v1145_v28, 1e-24  ;;  %v586_v62 = vadd.f32 %v585_v27, %v2985_v48  ;;  %v716_v51 = vpop.f32.mrf.mxu3 }
 0x26a   :  { %v1494_v35 = vmul.f32 %v1894_v36, %v1493_v57  ;;  %v1500_v45 = vmul.f32 %v1896_v1, %v1182_v42  ;;  %vm1506_vm13 = vweird.f32 %v1896_v1 }
 0x26b   :  { %1897 = vrsqrt.f32 %v1183_v32  ;;  %v717_v10 = vadd.f32 %v716_v51, %v586_v62  ;;  %vm1507_vm15 = vmor %vm1505_vm14, %vm1506_vm13  ;;  %vm1515_vm1 = vweird.f32 %v1183_v32 }
 0x26c   :  { %v1498_v61 = vsel %vm1497_vm12, %v1894_v36, %v1494_v35  ;;  %v1501_v41 = vmul.f32 %v1896_v1, %v1500_v45 }
 0x26d   :  { %v1599_v49 = vmul.f32 %v1498_v61, %v3440_v55  ;;  %v1675_v6 = vmul.f32 %v1498_v61, %v3443_v38  ;;  %1753 = vst [vmem:[%s3763_s7 + $0x100] sm:$0xff] %v717_v10 }
 0x26e   :  { %v1502_v24 = vmul.f32 0.5, %v1501_v41  ;;  %v1104_v21 = vpop.xlane.xlu2 %1103  ;;  %v990_v18 = vpop.xlane.xlu0 %989 }
 0x26f   :  { %1637 = vst [vmem:[#allocation2 + $0x1e0] sm:$0xff] %v1599_v49  ;;  %v1146_v25 = vadd.f32 %v1104_v21, %v990_v18 }
 0x270   :  { %1713 = vst [vmem:[#allocation2 + $0x1e8] sm:$0xff] %v1675_v6  ;;  %v1503_v14 = vsub.f32 1.5, %v1502_v24  ;;  %v588_v40 = vpop.f32.mrf.mxu2 }
 0x271   :  { %v1898_v34 = vpop.eup %1897  ;;  %v1184_v46 = vmax.f32 %v1146_v25, 1e-24  ;;  %v589_v13 = vadd.f32 %v588_v40, %v2985_v48  ;;  %v719_v55 = vpop.f32.mrf.mxu3 }
 0x272   :  { %v1504_v16 = vmul.f32 %v1896_v1, %v1503_v14  ;;  %v1510_v38 = vmul.f32 %v1898_v34, %v1183_v32  ;;  %vm1516_vm0 = vweird.f32 %v1898_v34 }
 0x273   :  { %1899 = vrsqrt.f32 %v1184_v46  ;;  %v720_v7 = vadd.f32 %v719_v55, %v589_v13  ;;  %vm1517_vm2 = vmor %vm1515_vm1, %vm1516_vm0  ;;  %vm1525_vm4 = vweird.f32 %v1184_v46 }
 0x274   :  { %v1508_v30 = vsel %vm1507_vm15, %v1896_v1, %v1504_v16  ;;  %v1511_v23 = vmul.f32 %v1898_v34, %v1510_v38 }
 0x275   :  { %v1600_v8 = vmul.f32 %v1508_v30, %v3469_v26  ;;  %v1676_v43 = vmul.f32 %v1508_v30, %v3472_v15  ;;  %1754 = vst [vmem:[%s3763_s7 + $0x108] sm:$0xff] %v720_v7 }
 0x276   :  { %v1512_v56 = vmul.f32 0.5, %v1511_v23  ;;  %v992_v17 = vpop.xlane.xlu1 %991  ;;  %v1106_v47 = vpop.xlane.xlu0 %1105 }
 0x277   :  { %1638 = vst [vmem:[#allocation2 + $0x1f0] sm:$0xff] %v1600_v8  ;;  %v1147_v20 = vadd.f32 %v1106_v47, %v992_v17 }
 0x278   :  { %1714 = vst [vmem:[#allocation2 + $0x1f8] sm:$0xff] %v1676_v43  ;;  %v1513_v36 = vsub.f32 1.5, %v1512_v56  ;;  %v591_v42 = vpop.f32.mrf.mxu2 }
 0x279   :  { %v1900_v39 = vpop.eup %1899  ;;  %v1185_v60 = vmax.f32 %v1147_v20, 1e-24  ;;  %v592_v44 = vadd.f32 %v591_v42, %v2985_v48  ;;  %v722_v26 = vpop.f32.mrf.mxu3 }
 0x27a   :  { %v1514_v9 = vmul.f32 %v1898_v34, %v1513_v36  ;;  %v1520_v15 = vmul.f32 %v1900_v39, %v1184_v46  ;;  %vm1526_vm3 = vweird.f32 %v1900_v39 }
 0x27b   :  { %1901 = vrsqrt.f32 %v1185_v60  ;;  %v723_v54 = vadd.f32 %v722_v26, %v592_v44  ;;  %vm1527_vm5 = vmor %vm1525_vm4, %vm1526_vm3  ;;  %vm1535_vm7 = vweird.f32 %v1185_v60 }
 0x27c   :  { %v1518_v33 = vsel %vm1517_vm2, %v1898_v34, %v1514_v9  ;;  %v1521_v37 = vmul.f32 %v1900_v39, %v1520_v15 }
 0x27d   :  { %v1601_v3 = vmul.f32 %v1518_v33, %v3498_v4  ;;  %v1677_v31 = vmul.f32 %v1518_v33, %v3501_v50  ;;  %1755 = vst [vmem:[%s3763_s7 + $0x110] sm:$0xff] %v723_v54 }
 0x27e   :  { %v1522_v12 = vmul.f32 0.5, %v1521_v37  ;;  %v994_v19 = vpop.xlane.xlu2 %993 }
 0x27f   :  { %1639 = vst [vmem:[#allocation2 + $0x200] sm:$0xff] %v1601_v3 }
 0x280   :  { %1715 = vst [vmem:[#allocation2 + $0x208] sm:$0xff] %v1677_v31  ;;  %v1523_v5 = vsub.f32 1.5, %v1522_v12  ;;  %v594_v28 = vpop.f32.mrf.mxu2 }
 0x281   :  { %v1902_v57 = vpop.eup %1901  ;;  %v595_v27 = vadd.f32 %v594_v28, %v2985_v48  ;;  %v725_v1 = vpop.f32.mrf.mxu3 }
 0x282   :  { %v1524_v32 = vmul.f32 %v1900_v39, %v1523_v5  ;;  %v1530_v4 = vmul.f32 %v1902_v57, %v1185_v60  ;;  %vm1536_vm6 = vweird.f32 %v1902_v57 }
 0x283   :  { %v726_v50 = vadd.f32 %v725_v1, %v595_v27  ;;  %vm1537_vm8 = vmor %vm1535_vm7, %vm1536_vm6 }
 0x284   :  { %v1528_v62 = vsel %vm1527_vm5, %v1900_v39, %v1524_v32  ;;  %v1531_v51 = vmul.f32 %v1902_v57, %v1530_v4 }
 0x285   :  { %v1602_v35 = vmul.f32 %v1528_v62, %v3527_v52  ;;  %v1678_v45 = vmul.f32 %v1528_v62, %v3530_v11  ;;  %1756 = vst [vmem:[%s3763_s7 + $0x118] sm:$0xff] %v726_v50 }
 0x286   :  { %v1532_v10 = vmul.f32 0.5, %v1531_v51  ;;  %v1110_v61 = vpop.xlane.xlu2 %1109  ;;  %v996_v41 = vpop.xlane.xlu0 %995 }
 0x287   :  { %1640 = vst [vmem:[#allocation2 + $0x210] sm:$0xff] %v1602_v35  ;;  %v1149_v49 = vadd.f32 %v1110_v61, %v996_v41 }
 0x288   :  { %1716 = vst [vmem:[#allocation2 + $0x218] sm:$0xff] %v1678_v45  ;;  %v1533_v6 = vsub.f32 1.5, %v1532_v10  ;;  %v597_v24 = vpop.f32.mrf.mxu2 }
 0x289   :  { %v1187_v21 = vmax.f32 %v1149_v49, 1e-24  ;;  %v598_v18 = vadd.f32 %v597_v24, %v2985_v48  ;;  %v728_v25 = vpop.f32.mrf.mxu3 }
 0x28a   :  { %v1534_v52 = vmul.f32 %v1902_v57, %v1533_v6 }
 0x28b   :  { %1903 = vrsqrt.f32 %v1187_v21  ;;  %v729_v11 = vadd.f32 %v728_v25, %v598_v18  ;;  %vm1555_vm10 = vweird.f32 %v1187_v21 }
 0x28c   :  { %v1538_v14 = vsel %vm1537_vm8, %v1902_v57, %v1534_v52 }
 0x28d   :  { %v1603_v40 = vmul.f32 %v1538_v14, %v3556_v22  ;;  %v1679_v34 = vmul.f32 %v1538_v14, %v3559_v0  ;;  %1757 = vst [vmem:[%s3763_s7 + $0x120] sm:$0xff] %v729_v11 }
 0x28e   :  { %v998_v46 = vpop.xlane.xlu1 %997  ;;  %v1112_v13 = vpop.xlane.xlu0 %1111 }
 0x28f   :  { %1641 = vst [vmem:[#allocation2 + $0x220] sm:$0xff] %v1603_v40  ;;  %v1150_v55 = vadd.f32 %v1112_v13, %v998_v46 }
 0x290   :  { %1717 = vst [vmem:[#allocation2 + $0x228] sm:$0xff] %v1679_v34  ;;  %v600_v16 = vpop.f32.mrf.mxu2 }
 0x291   :  { %v1904_v38 = vpop.eup %1903  ;;  %v1188_v7 = vmax.f32 %v1150_v55, 1e-24  ;;  %v601_v30 = vadd.f32 %v600_v16, %v2985_v48  ;;  %v731_v23 = vpop.f32.mrf.mxu3 }
 0x292   :  { %v1550_v8 = vmul.f32 %v1904_v38, %v1187_v21  ;;  %vm1556_vm9 = vweird.f32 %v1904_v38 }
 0x293   :  { %1905 = vrsqrt.f32 %v1188_v7  ;;  %v732_v22 = vadd.f32 %v731_v23, %v601_v30  ;;  %vm1557_vm11 = vmor %vm1555_vm10, %vm1556_vm9  ;;  %vm1565_vm13 = vweird.f32 %v1188_v7 }
 0x294   :  { %v1551_v43 = vmul.f32 %v1904_v38, %v1550_v8 }
 0x295   :  { %1758 = vst [vmem:[%s3763_s7 + $0x128] sm:$0xff] %v732_v22  ;;  %s1960_s7 = smov [#allocation2]  }
 0x296   :  { %v1552_v0 = vmul.f32 0.5, %v1551_v43  ;;  %v1108_v56 = vpop.xlane.xlu1 %1107  ;;  %s1763_s2 = sshll.u32 %s1960_s7, 4  ;;  %s1764_s2 = int_to_ptr.vmem [resolvable:$true] %s1763_s2 }
 0x297   :  { %v1148_v17 = vadd.f32 %v1108_v56, %v994_v19 }
 0x298   :  { %v1553_v47 = vsub.f32 1.5, %v1552_v0 }
 0x299   :  { %v1906_v20 = vpop.eup %1905  ;;  %v1186_v36 = vmax.f32 %v1148_v17, 1e-24 }
 0x29a   :  { %v1554_v42 = vmul.f32 %v1904_v38, %v1553_v47  ;;  %v1560_v39 = vmul.f32 %v1906_v20, %v1188_v7  ;;  %vm1566_vm12 = vweird.f32 %v1906_v20 }
 0x29b   :  { %1907 = vrsqrt.f32 %v1186_v36  ;;  %vm1567_vm14 = vmor %vm1565_vm13, %vm1566_vm12  ;;  %vm1545_vm0 = vweird.f32 %v1186_v36 }
 0x29c   :  { %v1558_v48 = vsel %vm1557_vm11, %v1904_v38, %v1554_v42  ;;  %v1561_v60 = vmul.f32 %v1906_v20, %v1560_v39 }
 0x29d   :  { %v1605_v44 = vmul.f32 %v1558_v48, %v3611_v29  ;;  %v1681_v26 = vmul.f32 %v1558_v48, %v3614_v53 }
 0x29e   :  { %v1562_v9 = vmul.f32 0.5, %v1561_v60 }
 0x29f   :  { %1643 = vst [vmem:[#allocation2 + $0x240] sm:$0xff] %v1605_v44 }
 0x2a0   :  { %1719 = vst [vmem:[#allocation2 + $0x248] sm:$0xff] %v1681_v26  ;;  %v1563_v15 = vsub.f32 1.5, %v1562_v9 }
 0x2a1   :  { %v1908_v54 = vpop.eup %1907 }
 0x2a2   :  { %v1564_v33 = vmul.f32 %v1906_v20, %v1563_v15  ;;  %v1540_v37 = vmul.f32 %v1908_v54, %v1186_v36  ;;  %vm1546_vm15 = vweird.f32 %v1908_v54 }
 0x2a3   :  { %vm1547_vm1 = vmor %vm1545_vm0, %vm1546_vm15 }
 0x2a4   :  { %v1568_v3 = vsel %vm1567_vm14, %v1906_v20, %v1564_v33  ;;  %v1541_v31 = vmul.f32 %v1908_v54, %v1540_v37 }
 0x2a5   :  { %v1606_v12 = vmul.f32 %v1568_v3, %v3634_v59  ;;  %v1682_v19 = vmul.f32 %v1568_v3, %v3637_v58 }
 0x2a6   :  { %v1542_v5 = vmul.f32 0.5, %v1541_v31 }
 0x2a7   :  { %1644 = vst [vmem:[#allocation2 + $0x250] sm:$0xff] %v1606_v12 }
 0x2a8   :  { %1720 = vst [vmem:[#allocation2 + $0x258] sm:$0xff] %v1682_v19  ;;  %v1543_v29 = vsub.f32 1.5, %v1542_v5 }
 0x2aa   :  { %v1544_v53 = vmul.f32 %v1908_v54, %v1543_v29 }
 0x2ac   :  { %v1548_v28 = vsel %vm1547_vm1, %v1908_v54, %v1544_v53 }
 0x2ad   :  { %v1604_v57 = vmul.f32 %v1548_v28, %v3587_v63  ;;  %v1680_v59 = vmul.f32 %v1548_v28, %v3649_v2 }
 0x2af   :  { %1642 = vst [vmem:[#allocation2 + $0x230] sm:$0xff] %v1604_v57 }
 0x2b0   :  { %1718 = vst [vmem:[#allocation2 + $0x238] sm:$0xff] %v1680_v59 }
 0x2b1   :  { %1771 = dma.vmem_to_hbm [thread:$0]  %s1764_s2, 9728, %s1766_s19, [#allocation3], %s1961_s3, %s1961_s3, %s1962_s20  }
 0x2b2   :  { %1958 = dma.done.wait [#allocation3], 9728  }
 0x2b3   :  { %1959 = vsyncadd [#allocation3], 4294957568 }
 0x2b4   :  { %1780 = vsyncpa [#allocation3], 1 }

</bundles_post_ra>
